<compile_context>
chip_gen: v6e
topology: v6e:2x2x1
jax: 0.10.0
libtpu: 0.0.40
codegen_flags: <defaults>
</compile_context>

<pallas_src>
import math

import jax
import jax.numpy as jnp
from jax.experimental import pallas as pl
from jax.experimental.pallas import tpu as pltpu

# ---- GanConfig fields used by this module (synthetic, small) ----
DICTIONARY_SIZE = 16   # V  (element_size of the soft one-hot input)
DIS_EMB_SIZE    = 32   # E  (dis_emb_size == d_model == dense_input_size)
DIS_HIDDEN_1    = 32   # nhid (transformer feed-forward dim)
N_HEAD          = 2    # TODO(synk): distsup TransformerModel nhead/nlayers defaults not in snippet; assuming 2/2.
N_LAYERS        = 2
LN_EPS          = 1e-5


# ----------------------------- fused Pallas kernel -----------------------------

def _fused_kernel(x_ref, emb_ref, pe_ref, wqkv_ref, bqkv_ref, wo_ref,
                  w1_ref, b1_ref, w2_ref, vecs_ref, dw_ref, db_ref, o_ref):
    """One batch tile (TB elements) per grid step: full transformer forward in VMEM."""
    TB, L, V = x_ref.shape
    E = emb_ref.shape[1]
    n_layers = w1_ref.shape[0]
    n_head = wo_ref.shape[0] // n_layers
    Dh = E // n_head
    M = TB * L                                 # flattened (batch*seq) matmul rows

    def layernorm(y, g, b):
        mu = jnp.mean(y, axis=-1, keepdims=True)
        var = jnp.mean((y - mu) ** 2, axis=-1, keepdims=True)
        return (y - mu) * jax.lax.rsqrt(var + LN_EPS) * g + b

    # Embedding matmul (sqrt(E) pre-folded into the weight) + positional encoding.
    x2 = x_ref[...].reshape(M, V).astype(jnp.bfloat16)
    emb = jnp.dot(x2, emb_ref[...], preferred_element_type=jnp.float32)       # (M, E) f32
    h = (emb.reshape(TB, L, E) + pe_ref[...]).reshape(M, E)                   # f32

    for l in range(n_layers):
        hb = h.astype(jnp.bfloat16)

        # --- multi-head self-attention; per-head weights indexed on a leading axis ---
        qs, ks, vs = [], [], []
        for hd in range(n_head):
            iq = (l * 3 + 0) * n_head + hd
            ik = (l * 3 + 1) * n_head + hd
            iv = (l * 3 + 2) * n_head + hd
            q = jnp.dot(hb, wqkv_ref[iq], preferred_element_type=jnp.float32) + bqkv_ref[iq]
            k = jnp.dot(hb, wqkv_ref[ik], preferred_element_type=jnp.float32) + bqkv_ref[ik]
            v = jnp.dot(hb, wqkv_ref[iv], preferred_element_type=jnp.float32) + bqkv_ref[iv]
            qs.append(q.reshape(TB, L, Dh))
            ks.append(k.reshape(TB, L, Dh))
            vs.append(v.reshape(TB, L, Dh))

        # Stack heads along the batch axis -> one softmax for all heads & batch elements.
        q_all = jnp.concatenate(qs, axis=0).astype(jnp.bfloat16)              # (H*TB, L, Dh)
        k_all = jnp.concatenate(ks, axis=0).astype(jnp.bfloat16)
        v_all = jnp.concatenate(vs, axis=0).astype(jnp.bfloat16)

        s = jnp.einsum('bqd,bkd->bqk', q_all, k_all,
                       preferred_element_type=jnp.float32)                    # (H*TB, L, L)
        s = s - jnp.max(s, axis=-1, keepdims=True)
        p = jnp.exp(s)
        p = p * pl.reciprocal(jnp.sum(p, axis=-1, keepdims=True), approx=True)
        ctx = jnp.einsum('bqk,bkd->bqd', p.astype(jnp.bfloat16), v_all,
                         preferred_element_type=jnp.float32)                  # (H*TB, L, Dh)

        a = jnp.zeros((M, E), jnp.float32)
        for hd in range(n_head):
            ctx_h = ctx[hd * TB:(hd + 1) * TB].reshape(M, Dh).astype(jnp.bfloat16)
            a = a + jnp.dot(ctx_h, wo_ref[l * n_head + hd],
                            preferred_element_type=jnp.float32)
        a = a + vecs_ref[l * 6 + 0]                                           # out_proj bias
        h = layernorm(h + a, vecs_ref[l * 6 + 2], vecs_ref[l * 6 + 3])        # post-norm 1

        # --- feed-forward: Linear(E->F) -> ReLU -> Linear(F->E) ---
        f = jnp.dot(h.astype(jnp.bfloat16), w1_ref[l],
                    preferred_element_type=jnp.float32) + b1_ref[l]
        f = jnp.maximum(f, 0.0)
        f = jnp.dot(f.astype(jnp.bfloat16), w2_ref[l],
                    preferred_element_type=jnp.float32) + vecs_ref[l * 6 + 1]
        h = layernorm(h + f, vecs_ref[l * 6 + 4], vecs_ref[l * 6 + 5])        # post-norm 2

    # mean over sequence dim, then final dense (E -> 1); one (TB, 1) block per step.
    y = jnp.mean(h.reshape(TB, L, E), axis=1)                                 # (TB, E)
    o_ref[...] = jnp.dot(y, dw_ref[...],
                         preferred_element_type=jnp.float32) + db_ref[...]    # (TB, 1)


def _resident_spec(shape):
    """Full-array block with a constant index_map: fetched once, resident across the grid."""
    zeros = (0,) * len(shape)
    return pl.BlockSpec(shape, lambda b, z=zeros: z)


# --------------------------- parameter construction ---------------------------

def _positional_encoding(max_len, d_model):
    pos = jnp.arange(max_len, dtype=jnp.float32)[:, None]
    div = jnp.exp(jnp.arange(0, d_model, 2, dtype=jnp.float32)
                  * (-math.log(10000.0) / d_model))
    pe = jnp.zeros((max_len, d_model), jnp.float32)
    pe = pe.at[:, 0::2].set(jnp.sin(pos * div))
    pe = pe.at[:, 1::2].set(jnp.cos(pos * div))
    return pe


def init_params(key, seq_len):
    V, E, F, n, H = DICTIONARY_SIZE, DIS_EMB_SIZE, DIS_HIDDEN_1, N_LAYERS, N_HEAD
    Dh = E // H
    k_emb, k_ip, k_op, k_w1, k_w2, k_d = jax.random.split(key, 6)

    # Embedding: xavier_uniform_ on (V, E); sqrt(E) src scale folded in at init.
    bound = math.sqrt(6.0 / (V + E))
    emb_w = jax.random.uniform(k_emb, (V, E), jnp.float32, -bound, bound)

    # MHA in_proj (q|k|v) weights, pre-transposed to (in=E, out=E), then split per head on a
    # leading axis. Attention scale 1/sqrt(Dh) is folded into the q weights (q bias is zero).
    in_proj = 0.02 * jax.random.normal(k_ip, (n, 3, E, E), jnp.float32)       # (layer, qkv, in, out)
    wqkv = in_proj.reshape(n, 3, E, H, Dh).transpose(0, 1, 3, 2, 4)           # (n, 3, H, E, Dh)
    wqkv = wqkv.at[:, 0].multiply(1.0 / math.sqrt(Dh))
    wqkv = wqkv.reshape(n * 3 * H, E, Dh).astype(jnp.bfloat16)
    bqkv = jnp.zeros((n * 3 * H, 1, Dh), jnp.float32)

    # MHA out_proj, pre-transposed to (in=E, out=E), split per head on the input axis.
    out_proj = 0.02 * jax.random.normal(k_op, (n, E, E), jnp.float32)
    wo = out_proj.reshape(n, H, Dh, E).reshape(n * H, Dh, E).astype(jnp.bfloat16)

    w1 = (0.02 * jax.random.normal(k_w1, (n, E, F), jnp.float32)).astype(jnp.bfloat16)
    w2 = (0.02 * jax.random.normal(k_w2, (n, F, E), jnp.float32)).astype(jnp.bfloat16)
    b1 = jnp.zeros((n, 1, F), jnp.float32)

    # Packed per-layer (1, E) vectors: [out_proj_b, b2, ln1_g, ln1_b, ln2_g, ln2_b].
    vec = jnp.stack([jnp.zeros((E,)), jnp.zeros((E,)), jnp.ones((E,)),
                     jnp.zeros((E,)), jnp.ones((E,)), jnp.zeros((E,))]).astype(jnp.float32)
    vecs = jnp.tile(vec[None], (n, 1, 1)).reshape(n * 6, 1, E)

    return dict(
        emb_w_scaled=(emb_w * math.sqrt(E)).astype(jnp.bfloat16),
        pe=_positional_encoding(seq_len, E),
        wqkv=wqkv, bqkv=bqkv, wo=wo, w1=w1, b1=b1, w2=w2, vecs=vecs,
        dense_w=0.02 * jax.random.normal(k_d, (E, 1), jnp.float32),
        dense_b=jnp.zeros((1, 1), jnp.float32),
    )


# --------------------------------- forward ---------------------------------

def transformer_discriminator_forward(x, params):
    B, L, V = x.shape

    # Batch tile: fill >=256 MXU rows per step (TB*L >= 256) when B allows; pad B to a multiple.
    TB = max(1, min(B, -(-256 // L)))
    B_pad = -(-B // TB) * TB
    if B_pad != B:
        x = jnp.pad(x, ((0, B_pad - B), (0, 0), (0, 0)))

    pred = pl.pallas_call(
        _fused_kernel,
        out_shape=jax.ShapeDtypeStruct((B_pad, 1), jnp.float32),
        grid=(B_pad // TB,),
        in_specs=[
            pl.BlockSpec((TB, L, V), lambda b: (b, 0, 0)),   # x: one batch tile per grid step
            _resident_spec(params['emb_w_scaled'].shape),     # (V, E) bf16, sqrt(E) folded in
            _resident_spec(params['pe'].shape),               # (L, E) f32
            _resident_spec(params['wqkv'].shape),             # (n*3*H, E, Dh) bf16
            _resident_spec(params['bqkv'].shape),             # (n*3*H, 1, Dh) f32
            _resident_spec(params['wo'].shape),               # (n*H, Dh, E) bf16
            _resident_spec(params['w1'].shape),               # (n, E, F) bf16
            _resident_spec(params['b1'].shape),               # (n, 1, F) f32
            _resident_spec(params['w2'].shape),               # (n, F, E) bf16
            _resident_spec(params['vecs'].shape),             # (n*6, 1, E) f32
            _resident_spec(params['dense_w'].shape),          # (E, 1) f32
            _resident_spec(params['dense_b'].shape),          # (1, 1) f32
        ],
        out_specs=pl.BlockSpec((TB, 1), lambda b: (b, 0)),
        compiler_params=pltpu.CompilerParams(
            dimension_semantics=("parallel",)),               # 2nd TensorCore on v7x
    )(x, params['emb_w_scaled'], params['pe'],
      params['wqkv'], params['bqkv'], params['wo'],
      params['w1'], params['b1'], params['w2'], params['vecs'],
      params['dense_w'], params['dense_b'])

    return pred[:B]


# ----------------------------------- main -----------------------------------

if __name__ == "__main__":
    key = jax.random.PRNGKey(0)
    k_param, k_x = jax.random.split(key)

    B, L, V = 2, 8, DICTIONARY_SIZE
    # soft one-hot token distributions, as produced by the GAN generator
    x = jax.nn.softmax(jax.random.normal(k_x, (B, L, V), jnp.float32), axis=-1)

    params = init_params(k_param, seq_len=L)

    fwd = jax.jit(transformer_discriminator_forward)
    pred = fwd(x, params)
    jax.block_until_ready(pred)

    assert pred.shape == (B, 1) and pred.dtype == jnp.float32
    assert bool(jnp.all(jnp.isfinite(pred)))
    print("KERNEL_OK")
</pallas_src>

<mosaic_0001>
module attributes {stable_mosaic.version = 11 : i64} {
  func.func @_fused_kernel(%arg0: i32, %arg1: memref<2x8x16xf32, #tpu.memory_space<vmem>>, %arg2: memref<16x32xbf16, #tpu.memory_space<vmem>>, %arg3: memref<8x32xf32, #tpu.memory_space<vmem>>, %arg4: memref<12x32x16xbf16, #tpu.memory_space<vmem>>, %arg5: memref<12x1x16xf32, #tpu.memory_space<vmem>>, %arg6: memref<4x16x32xbf16, #tpu.memory_space<vmem>>, %arg7: memref<2x32x32xbf16, #tpu.memory_space<vmem>>, %arg8: memref<2x1x32xf32, #tpu.memory_space<vmem>>, %arg9: memref<2x32x32xbf16, #tpu.memory_space<vmem>>, %arg10: memref<12x1x32xf32, #tpu.memory_space<vmem>>, %arg11: memref<32x1xf32, #tpu.memory_space<vmem>>, %arg12: memref<1x1xf32, #tpu.memory_space<vmem>>, %arg13: memref<2x1xf32, #tpu.memory_space<vmem>>) attributes {dimension_semantics = [#tpu.dimension_semantics<parallel>], iteration_bounds = array<i64: 1>, scalar_prefetch = 0 : i64, scratch_operands = 0 : i64, tpu.core_type = #tpu.core_type<tc>, window_params = [{transform_indices = @transform_0, window_bounds = array<i64: 2, 8, 16>}, {pipeline_mode = #tpu.pipeline_mode<synchronous>, transform_indices = @transform_1, window_bounds = array<i64: 16, 32>}, {pipeline_mode = #tpu.pipeline_mode<synchronous>, transform_indices = @transform_2, window_bounds = array<i64: 8, 32>}, {pipeline_mode = #tpu.pipeline_mode<synchronous>, transform_indices = @transform_3, window_bounds = array<i64: 12, 32, 16>}, {pipeline_mode = #tpu.pipeline_mode<synchronous>, transform_indices = @transform_4, window_bounds = array<i64: 12, 1, 16>}, {pipeline_mode = #tpu.pipeline_mode<synchronous>, transform_indices = @transform_5, window_bounds = array<i64: 4, 16, 32>}, {pipeline_mode = #tpu.pipeline_mode<synchronous>, transform_indices = @transform_6, window_bounds = array<i64: 2, 32, 32>}, {pipeline_mode = #tpu.pipeline_mode<synchronous>, transform_indices = @transform_7, window_bounds = array<i64: 2, 1, 32>}, {pipeline_mode = #tpu.pipeline_mode<synchronous>, transform_indices = @transform_8, window_bounds = array<i64: 2, 32, 32>}, {pipeline_mode = #tpu.pipeline_mode<synchronous>, transform_indices = @transform_9, window_bounds = array<i64: 12, 1, 32>}, {pipeline_mode = #tpu.pipeline_mode<synchronous>, transform_indices = @transform_10, window_bounds = array<i64: 32, 1>}, {pipeline_mode = #tpu.pipeline_mode<synchronous>, transform_indices = @transform_11, window_bounds = array<i64: 1, 1>}, {transform_indices = @transform_12, window_bounds = array<i64: 2, 1>}]} {
    %c0 = arith.constant 0 : index
    %c0_0 = arith.constant 0 : index
    %c0_1 = arith.constant 0 : index
    %0 = vector.load %arg1[%c0, %c0_0, %c0_1] : memref<2x8x16xf32, #tpu.memory_space<vmem>>, vector<2x8x16xf32>
    %1 = vector.shape_cast %0 : vector<2x8x16xf32> to vector<16x16xf32>
    %2 = arith.truncf %1 : vector<16x16xf32> to vector<16x16xbf16>
    %c0_2 = arith.constant 0 : index
    %c0_3 = arith.constant 0 : index
    %3 = vector.load %arg2[%c0_2, %c0_3] : memref<16x32xbf16, #tpu.memory_space<vmem>>, vector<16x32xbf16>
    %cst = arith.constant dense<0.000000e+00> : vector<16x32xf32>
    %4 = tpu.matmul %2, %3, %cst {dimension_numbers = #tpu.dot_dimension_numbers<[1], [0], [0], [1], [0, 0, 1, 1], [], []>} : vector<16x16xbf16>, vector<16x32xbf16>, vector<16x32xf32> -> vector<16x32xf32>
    %5 = vector.shape_cast %4 : vector<16x32xf32> to vector<2x8x32xf32>
    %c0_4 = arith.constant 0 : index
    %c0_5 = arith.constant 0 : index
    %6 = vector.load %arg3[%c0_4, %c0_5] : memref<8x32xf32, #tpu.memory_space<vmem>>, vector<8x32xf32>
    %7 = vector.shape_cast %6 : vector<8x32xf32> to vector<1x8x32xf32>
    %8 = vector.broadcast %7 : vector<1x8x32xf32> to vector<2x8x32xf32>
    %9 = arith.addf %5, %8 : vector<2x8x32xf32>
    %10 = vector.shape_cast %9 : vector<2x8x32xf32> to vector<16x32xf32>
    %11 = arith.truncf %10 : vector<16x32xf32> to vector<16x32xbf16>
    %c0_6 = arith.constant 0 : index
    %c0_7 = arith.constant 0 : index
    %c0_8 = arith.constant 0 : index
    %12 = vector.load %arg4[%c0_6, %c0_7, %c0_8] : memref<12x32x16xbf16, #tpu.memory_space<vmem>>, vector<1x32x16xbf16>
    %13 = vector.shape_cast %12 : vector<1x32x16xbf16> to vector<32x16xbf16>
    %cst_9 = arith.constant dense<0.000000e+00> : vector<16x16xf32>
    %14 = tpu.matmul %11, %13, %cst_9 {dimension_numbers = #tpu.dot_dimension_numbers<[1], [0], [0], [1], [0, 0, 1, 1], [], []>} : vector<16x32xbf16>, vector<32x16xbf16>, vector<16x16xf32> -> vector<16x16xf32>
    %c0_10 = arith.constant 0 : index
    %c0_11 = arith.constant 0 : index
    %c0_12 = arith.constant 0 : index
    %15 = vector.load %arg5[%c0_10, %c0_11, %c0_12] : memref<12x1x16xf32, #tpu.memory_space<vmem>>, vector<1x1x16xf32>
    %16 = vector.shape_cast %15 : vector<1x1x16xf32> to vector<1x16xf32>
    %17 = vector.broadcast %16 : vector<1x16xf32> to vector<16x16xf32>
    %18 = arith.addf %14, %17 : vector<16x16xf32>
    %c2 = arith.constant 2 : index
    %c0_13 = arith.constant 0 : index
    %c0_14 = arith.constant 0 : index
    %19 = vector.load %arg4[%c2, %c0_13, %c0_14] : memref<12x32x16xbf16, #tpu.memory_space<vmem>>, vector<1x32x16xbf16>
    %20 = vector.shape_cast %19 : vector<1x32x16xbf16> to vector<32x16xbf16>
    %cst_15 = arith.constant dense<0.000000e+00> : vector<16x16xf32>
    %21 = tpu.matmul %11, %20, %cst_15 {dimension_numbers = #tpu.dot_dimension_numbers<[1], [0], [0], [1], [0, 0, 1, 1], [], []>} : vector<16x32xbf16>, vector<32x16xbf16>, vector<16x16xf32> -> vector<16x16xf32>
    %c2_16 = arith.constant 2 : index
    %c0_17 = arith.constant 0 : index
    %c0_18 = arith.constant 0 : index
    %22 = vector.load %arg5[%c2_16, %c0_17, %c0_18] : memref<12x1x16xf32, #tpu.memory_space<vmem>>, vector<1x1x16xf32>
    %23 = vector.shape_cast %22 : vector<1x1x16xf32> to vector<1x16xf32>
    %24 = vector.broadcast %23 : vector<1x16xf32> to vector<16x16xf32>
    %25 = arith.addf %21, %24 : vector<16x16xf32>
    %c4 = arith.constant 4 : index
    %c0_19 = arith.constant 0 : index
    %c0_20 = arith.constant 0 : index
    %26 = vector.load %arg4[%c4, %c0_19, %c0_20] : memref<12x32x16xbf16, #tpu.memory_space<vmem>>, vector<1x32x16xbf16>
    %27 = vector.shape_cast %26 : vector<1x32x16xbf16> to vector<32x16xbf16>
    %cst_21 = arith.constant dense<0.000000e+00> : vector<16x16xf32>
    %28 = tpu.matmul %11, %27, %cst_21 {dimension_numbers = #tpu.dot_dimension_numbers<[1], [0], [0], [1], [0, 0, 1, 1], [], []>} : vector<16x32xbf16>, vector<32x16xbf16>, vector<16x16xf32> -> vector<16x16xf32>
    %c4_22 = arith.constant 4 : index
    %c0_23 = arith.constant 0 : index
    %c0_24 = arith.constant 0 : index
    %29 = vector.load %arg5[%c4_22, %c0_23, %c0_24] : memref<12x1x16xf32, #tpu.memory_space<vmem>>, vector<1x1x16xf32>
    %30 = vector.shape_cast %29 : vector<1x1x16xf32> to vector<1x16xf32>
    %31 = vector.broadcast %30 : vector<1x16xf32> to vector<16x16xf32>
    %32 = arith.addf %28, %31 : vector<16x16xf32>
    %33 = vector.shape_cast %18 : vector<16x16xf32> to vector<2x8x16xf32>
    %34 = vector.shape_cast %25 : vector<16x16xf32> to vector<2x8x16xf32>
    %35 = vector.shape_cast %32 : vector<16x16xf32> to vector<2x8x16xf32>
    %c1 = arith.constant 1 : index
    %c0_25 = arith.constant 0 : index
    %c0_26 = arith.constant 0 : index
    %36 = vector.load %arg4[%c1, %c0_25, %c0_26] : memref<12x32x16xbf16, #tpu.memory_space<vmem>>, vector<1x32x16xbf16>
    %37 = vector.shape_cast %36 : vector<1x32x16xbf16> to vector<32x16xbf16>
    %cst_27 = arith.constant dense<0.000000e+00> : vector<16x16xf32>
    %38 = tpu.matmul %11, %37, %cst_27 {dimension_numbers = #tpu.dot_dimension_numbers<[1], [0], [0], [1], [0, 0, 1, 1], [], []>} : vector<16x32xbf16>, vector<32x16xbf16>, vector<16x16xf32> -> vector<16x16xf32>
    %c1_28 = arith.constant 1 : index
    %c0_29 = arith.constant 0 : index
    %c0_30 = arith.constant 0 : index
    %39 = vector.load %arg5[%c1_28, %c0_29, %c0_30] : memref<12x1x16xf32, #tpu.memory_space<vmem>>, vector<1x1x16xf32>
    %40 = vector.shape_cast %39 : vector<1x1x16xf32> to vector<1x16xf32>
    %41 = vector.broadcast %40 : vector<1x16xf32> to vector<16x16xf32>
    %42 = arith.addf %38, %41 : vector<16x16xf32>
    %c3 = arith.constant 3 : index
    %c0_31 = arith.constant 0 : index
    %c0_32 = arith.constant 0 : index
    %43 = vector.load %arg4[%c3, %c0_31, %c0_32] : memref<12x32x16xbf16, #tpu.memory_space<vmem>>, vector<1x32x16xbf16>
    %44 = vector.shape_cast %43 : vector<1x32x16xbf16> to vector<32x16xbf16>
    %cst_33 = arith.constant dense<0.000000e+00> : vector<16x16xf32>
    %45 = tpu.matmul %11, %44, %cst_33 {dimension_numbers = #tpu.dot_dimension_numbers<[1], [0], [0], [1], [0, 0, 1, 1], [], []>} : vector<16x32xbf16>, vector<32x16xbf16>, vector<16x16xf32> -> vector<16x16xf32>
    %c3_34 = arith.constant 3 : index
    %c0_35 = arith.constant 0 : index
    %c0_36 = arith.constant 0 : index
    %46 = vector.load %arg5[%c3_34, %c0_35, %c0_36] : memref<12x1x16xf32, #tpu.memory_space<vmem>>, vector<1x1x16xf32>
    %47 = vector.shape_cast %46 : vector<1x1x16xf32> to vector<1x16xf32>
    %48 = vector.broadcast %47 : vector<1x16xf32> to vector<16x16xf32>
    %49 = arith.addf %45, %48 : vector<16x16xf32>
    %c5 = arith.constant 5 : index
    %c0_37 = arith.constant 0 : index
    %c0_38 = arith.constant 0 : index
    %50 = vector.load %arg4[%c5, %c0_37, %c0_38] : memref<12x32x16xbf16, #tpu.memory_space<vmem>>, vector<1x32x16xbf16>
    %51 = vector.shape_cast %50 : vector<1x32x16xbf16> to vector<32x16xbf16>
    %cst_39 = arith.constant dense<0.000000e+00> : vector<16x16xf32>
    %52 = tpu.matmul %11, %51, %cst_39 {dimension_numbers = #tpu.dot_dimension_numbers<[1], [0], [0], [1], [0, 0, 1, 1], [], []>} : vector<16x32xbf16>, vector<32x16xbf16>, vector<16x16xf32> -> vector<16x16xf32>
    %c5_40 = arith.constant 5 : index
    %c0_41 = arith.constant 0 : index
    %c0_42 = arith.constant 0 : index
    %53 = vector.load %arg5[%c5_40, %c0_41, %c0_42] : memref<12x1x16xf32, #tpu.memory_space<vmem>>, vector<1x1x16xf32>
    %54 = vector.shape_cast %53 : vector<1x1x16xf32> to vector<1x16xf32>
    %55 = vector.broadcast %54 : vector<1x16xf32> to vector<16x16xf32>
    %56 = arith.addf %52, %55 : vector<16x16xf32>
    %57 = vector.shape_cast %42 : vector<16x16xf32> to vector<2x8x16xf32>
    %58 = vector.shape_cast %49 : vector<16x16xf32> to vector<2x8x16xf32>
    %59 = vector.shape_cast %56 : vector<16x16xf32> to vector<2x8x16xf32>
    %60 = tpu.concatenate %33, %57 in 0 : vector<2x8x16xf32>, vector<2x8x16xf32> -> vector<4x8x16xf32>
    %61 = arith.truncf %60 : vector<4x8x16xf32> to vector<4x8x16xbf16>
    %62 = tpu.concatenate %34, %58 in 0 : vector<2x8x16xf32>, vector<2x8x16xf32> -> vector<4x8x16xf32>
    %63 = arith.truncf %62 : vector<4x8x16xf32> to vector<4x8x16xbf16>
    %64 = tpu.concatenate %35, %59 in 0 : vector<2x8x16xf32>, vector<2x8x16xf32> -> vector<4x8x16xf32>
    %65 = arith.truncf %64 : vector<4x8x16xf32> to vector<4x8x16xbf16>
    "tpu.trace_start"() <{level = 10 : i32, message = "bqd,bkd->bqk"}> : () -> ()
    %cst_43 = arith.constant dense<0.000000e+00> : vector<4x8x8xf32>
    %66 = tpu.matmul %61, %63, %cst_43 {dimension_numbers = #tpu.dot_dimension_numbers<[2], [2], [1], [1], [0, 0, 0, 1, 1, 1], [0], [0]>} : vector<4x8x16xbf16>, vector<4x8x16xbf16>, vector<4x8x8xf32> -> vector<4x8x8xf32>
    "tpu.trace_stop"() : () -> ()
    %cst_44 = arith.constant dense<0xFF800000> : vector<4x8xf32>
    %67 = vector.multi_reduction <maximumf>, %66, %cst_44 [2] : vector<4x8x8xf32> to vector<4x8xf32>
    %68 = vector.shape_cast %67 : vector<4x8xf32> to vector<4x8x1xf32>
    %69 = vector.broadcast %68 : vector<4x8x1xf32> to vector<4x8x8xf32>
    %70 = arith.subf %66, %69 : vector<4x8x8xf32>
    %71 = math.exp %70 : vector<4x8x8xf32>
    %cst_45 = arith.constant dense<0.000000e+00> : vector<4x8xf32>
    %72 = vector.multi_reduction <add>, %71, %cst_45 [2] : vector<4x8x8xf32> to vector<4x8xf32>
    %73 = vector.shape_cast %72 : vector<4x8xf32> to vector<4x8x1xf32>
    %74 = tpu.reciprocal %73 {approx = true} : vector<4x8x1xf32> -> vector<4x8x1xf32>
    %75 = vector.broadcast %74 : vector<4x8x1xf32> to vector<4x8x8xf32>
    %76 = arith.mulf %71, %75 : vector<4x8x8xf32>
    %77 = arith.truncf %76 : vector<4x8x8xf32> to vector<4x8x8xbf16>
    "tpu.trace_start"() <{level = 10 : i32, message = "bqk,bkd->bqd"}> : () -> ()
    %cst_46 = arith.constant dense<0.000000e+00> : vector<4x8x16xf32>
    %78 = tpu.matmul %77, %65, %cst_46 {dimension_numbers = #tpu.dot_dimension_numbers<[2], [1], [1], [2], [0, 0, 0, 1, 1, 2], [0], [0]>} : vector<4x8x8xbf16>, vector<4x8x16xbf16>, vector<4x8x16xf32> -> vector<4x8x16xf32>
    %cst_47 = arith.constant 0.000000e+00 : f32
    "tpu.trace_stop"() : () -> ()
    %79 = vector.broadcast %cst_47 : f32 to vector<16x32xf32>
    %80 = vector.extract_strided_slice %78 {offsets = [0, 0, 0], sizes = [2, 8, 16], strides = [1, 1, 1]} : vector<4x8x16xf32> to vector<2x8x16xf32>
    %81 = vector.shape_cast %80 : vector<2x8x16xf32> to vector<16x16xf32>
    %82 = arith.truncf %81 : vector<16x16xf32> to vector<16x16xbf16>
    %c0_48 = arith.constant 0 : index
    %c0_49 = arith.constant 0 : index
    %c0_50 = arith.constant 0 : index
    %83 = vector.load %arg6[%c0_48, %c0_49, %c0_50] : memref<4x16x32xbf16, #tpu.memory_space<vmem>>, vector<1x16x32xbf16>
    %84 = vector.shape_cast %83 : vector<1x16x32xbf16> to vector<16x32xbf16>
    %cst_51 = arith.constant dense<0.000000e+00> : vector<16x32xf32>
    %85 = tpu.matmul %82, %84, %cst_51 {dimension_numbers = #tpu.dot_dimension_numbers<[1], [0], [0], [1], [0, 0, 1, 1], [], []>} : vector<16x16xbf16>, vector<16x32xbf16>, vector<16x32xf32> -> vector<16x32xf32>
    %86 = arith.addf %79, %85 : vector<16x32xf32>
    %87 = vector.extract_strided_slice %78 {offsets = [2, 0, 0], sizes = [2, 8, 16], strides = [1, 1, 1]} : vector<4x8x16xf32> to vector<2x8x16xf32>
    %88 = vector.shape_cast %87 : vector<2x8x16xf32> to vector<16x16xf32>
    %89 = arith.truncf %88 : vector<16x16xf32> to vector<16x16xbf16>
    %c1_52 = arith.constant 1 : index
    %c0_53 = arith.constant 0 : index
    %c0_54 = arith.constant 0 : index
    %90 = vector.load %arg6[%c1_52, %c0_53, %c0_54] : memref<4x16x32xbf16, #tpu.memory_space<vmem>>, vector<1x16x32xbf16>
    %91 = vector.shape_cast %90 : vector<1x16x32xbf16> to vector<16x32xbf16>
    %cst_55 = arith.constant dense<0.000000e+00> : vector<16x32xf32>
    %92 = tpu.matmul %89, %91, %cst_55 {dimension_numbers = #tpu.dot_dimension_numbers<[1], [0], [0], [1], [0, 0, 1, 1], [], []>} : vector<16x16xbf16>, vector<16x32xbf16>, vector<16x32xf32> -> vector<16x32xf32>
    %93 = arith.addf %86, %92 : vector<16x32xf32>
    %c0_56 = arith.constant 0 : index
    %c0_57 = arith.constant 0 : index
    %c0_58 = arith.constant 0 : index
    %94 = vector.load %arg10[%c0_56, %c0_57, %c0_58] : memref<12x1x32xf32, #tpu.memory_space<vmem>>, vector<1x1x32xf32>
    %95 = vector.shape_cast %94 : vector<1x1x32xf32> to vector<1x32xf32>
    %96 = vector.broadcast %95 : vector<1x32xf32> to vector<16x32xf32>
    %97 = arith.addf %93, %96 : vector<16x32xf32>
    %98 = arith.addf %10, %97 : vector<16x32xf32>
    %c2_59 = arith.constant 2 : index
    %c0_60 = arith.constant 0 : index
    %c0_61 = arith.constant 0 : index
    %99 = vector.load %arg10[%c2_59, %c0_60, %c0_61] : memref<12x1x32xf32, #tpu.memory_space<vmem>>, vector<1x1x32xf32>
    %100 = vector.shape_cast %99 : vector<1x1x32xf32> to vector<1x32xf32>
    %c3_62 = arith.constant 3 : index
    %c0_63 = arith.constant 0 : index
    %c0_64 = arith.constant 0 : index
    %101 = vector.load %arg10[%c3_62, %c0_63, %c0_64] : memref<12x1x32xf32, #tpu.memory_space<vmem>>, vector<1x1x32xf32>
    %102 = vector.shape_cast %101 : vector<1x1x32xf32> to vector<1x32xf32>
    %cst_65 = arith.constant dense<0.000000e+00> : vector<16xf32>
    %103 = vector.multi_reduction <add>, %98, %cst_65 [1] : vector<16x32xf32> to vector<16xf32>
    %104 = vector.shape_cast %103 : vector<16xf32> to vector<16x1xf32>
    %cst_66 = arith.constant 3.200000e+01 : f32
    %105 = vector.broadcast %cst_66 : f32 to vector<16x1xf32>
    %106 = arith.divf %104, %105 : vector<16x1xf32>
    %107 = vector.broadcast %106 : vector<16x1xf32> to vector<16x32xf32>
    %108 = arith.subf %98, %107 : vector<16x32xf32>
    %109 = arith.mulf %108, %108 : vector<16x32xf32>
    %cst_67 = arith.constant dense<0.000000e+00> : vector<16xf32>
    %110 = vector.multi_reduction <add>, %109, %cst_67 [1] : vector<16x32xf32> to vector<16xf32>
    %111 = vector.shape_cast %110 : vector<16xf32> to vector<16x1xf32>
    %cst_68 = arith.constant 3.200000e+01 : f32
    %112 = vector.broadcast %cst_68 : f32 to vector<16x1xf32>
    %113 = arith.divf %111, %112 : vector<16x1xf32>
    %114 = vector.broadcast %106 : vector<16x1xf32> to vector<16x32xf32>
    %115 = arith.subf %98, %114 : vector<16x32xf32>
    %cst_69 = arith.constant 9.99999974E-6 : f32
    %116 = vector.broadcast %cst_69 : f32 to vector<16x1xf32>
    %117 = arith.addf %113, %116 : vector<16x1xf32>
    %118 = math.rsqrt %117 : vector<16x1xf32>
    %119 = vector.broadcast %118 : vector<16x1xf32> to vector<16x32xf32>
    %120 = arith.mulf %115, %119 : vector<16x32xf32>
    %121 = vector.broadcast %100 : vector<1x32xf32> to vector<16x32xf32>
    %122 = arith.mulf %120, %121 : vector<16x32xf32>
    %123 = vector.broadcast %102 : vector<1x32xf32> to vector<16x32xf32>
    %124 = arith.addf %122, %123 : vector<16x32xf32>
    %125 = arith.truncf %124 : vector<16x32xf32> to vector<16x32xbf16>
    %c0_70 = arith.constant 0 : index
    %c0_71 = arith.constant 0 : index
    %c0_72 = arith.constant 0 : index
    %126 = vector.load %arg7[%c0_70, %c0_71, %c0_72] : memref<2x32x32xbf16, #tpu.memory_space<vmem>>, vector<1x32x32xbf16>
    %127 = vector.shape_cast %126 : vector<1x32x32xbf16> to vector<32x32xbf16>
    %cst_73 = arith.constant dense<0.000000e+00> : vector<16x32xf32>
    %128 = tpu.matmul %125, %127, %cst_73 {dimension_numbers = #tpu.dot_dimension_numbers<[1], [0], [0], [1], [0, 0, 1, 1], [], []>} : vector<16x32xbf16>, vector<32x32xbf16>, vector<16x32xf32> -> vector<16x32xf32>
    %c0_74 = arith.constant 0 : index
    %c0_75 = arith.constant 0 : index
    %c0_76 = arith.constant 0 : index
    %129 = vector.load %arg8[%c0_74, %c0_75, %c0_76] : memref<2x1x32xf32, #tpu.memory_space<vmem>>, vector<1x1x32xf32>
    %130 = vector.shape_cast %129 : vector<1x1x32xf32> to vector<1x32xf32>
    %131 = vector.broadcast %130 : vector<1x32xf32> to vector<16x32xf32>
    %132 = arith.addf %128, %131 : vector<16x32xf32>
    %cst_77 = arith.constant 0.000000e+00 : f32
    %133 = vector.broadcast %cst_77 : f32 to vector<16x32xf32>
    %134 = arith.maximumf %132, %133 : vector<16x32xf32>
    %135 = arith.truncf %134 : vector<16x32xf32> to vector<16x32xbf16>
    %c0_78 = arith.constant 0 : index
    %c0_79 = arith.constant 0 : index
    %c0_80 = arith.constant 0 : index
    %136 = vector.load %arg9[%c0_78, %c0_79, %c0_80] : memref<2x32x32xbf16, #tpu.memory_space<vmem>>, vector<1x32x32xbf16>
    %137 = vector.shape_cast %136 : vector<1x32x32xbf16> to vector<32x32xbf16>
    %cst_81 = arith.constant dense<0.000000e+00> : vector<16x32xf32>
    %138 = tpu.matmul %135, %137, %cst_81 {dimension_numbers = #tpu.dot_dimension_numbers<[1], [0], [0], [1], [0, 0, 1, 1], [], []>} : vector<16x32xbf16>, vector<32x32xbf16>, vector<16x32xf32> -> vector<16x32xf32>
    %c1_82 = arith.constant 1 : index
    %c0_83 = arith.constant 0 : index
    %c0_84 = arith.constant 0 : index
    %139 = vector.load %arg10[%c1_82, %c0_83, %c0_84] : memref<12x1x32xf32, #tpu.memory_space<vmem>>, vector<1x1x32xf32>
    %140 = vector.shape_cast %139 : vector<1x1x32xf32> to vector<1x32xf32>
    %141 = vector.broadcast %140 : vector<1x32xf32> to vector<16x32xf32>
    %142 = arith.addf %138, %141 : vector<16x32xf32>
    %143 = arith.addf %124, %142 : vector<16x32xf32>
    %c4_85 = arith.constant 4 : index
    %c0_86 = arith.constant 0 : index
    %c0_87 = arith.constant 0 : index
    %144 = vector.load %arg10[%c4_85, %c0_86, %c0_87] : memref<12x1x32xf32, #tpu.memory_space<vmem>>, vector<1x1x32xf32>
    %145 = vector.shape_cast %144 : vector<1x1x32xf32> to vector<1x32xf32>
    %c5_88 = arith.constant 5 : index
    %c0_89 = arith.constant 0 : index
    %c0_90 = arith.constant 0 : index
    %146 = vector.load %arg10[%c5_88, %c0_89, %c0_90] : memref<12x1x32xf32, #tpu.memory_space<vmem>>, vector<1x1x32xf32>
    %147 = vector.shape_cast %146 : vector<1x1x32xf32> to vector<1x32xf32>
    %cst_91 = arith.constant dense<0.000000e+00> : vector<16xf32>
    %148 = vector.multi_reduction <add>, %143, %cst_91 [1] : vector<16x32xf32> to vector<16xf32>
    %149 = vector.shape_cast %148 : vector<16xf32> to vector<16x1xf32>
    %cst_92 = arith.constant 3.200000e+01 : f32
    %150 = vector.broadcast %cst_92 : f32 to vector<16x1xf32>
    %151 = arith.divf %149, %150 : vector<16x1xf32>
    %152 = vector.broadcast %151 : vector<16x1xf32> to vector<16x32xf32>
    %153 = arith.subf %143, %152 : vector<16x32xf32>
    %154 = arith.mulf %153, %153 : vector<16x32xf32>
    %cst_93 = arith.constant dense<0.000000e+00> : vector<16xf32>
    %155 = vector.multi_reduction <add>, %154, %cst_93 [1] : vector<16x32xf32> to vector<16xf32>
    %156 = vector.shape_cast %155 : vector<16xf32> to vector<16x1xf32>
    %cst_94 = arith.constant 3.200000e+01 : f32
    %157 = vector.broadcast %cst_94 : f32 to vector<16x1xf32>
    %158 = arith.divf %156, %157 : vector<16x1xf32>
    %159 = vector.broadcast %151 : vector<16x1xf32> to vector<16x32xf32>
    %160 = arith.subf %143, %159 : vector<16x32xf32>
    %cst_95 = arith.constant 9.99999974E-6 : f32
    %161 = vector.broadcast %cst_95 : f32 to vector<16x1xf32>
    %162 = arith.addf %158, %161 : vector<16x1xf32>
    %163 = math.rsqrt %162 : vector<16x1xf32>
    %164 = vector.broadcast %163 : vector<16x1xf32> to vector<16x32xf32>
    %165 = arith.mulf %160, %164 : vector<16x32xf32>
    %166 = vector.broadcast %145 : vector<1x32xf32> to vector<16x32xf32>
    %167 = arith.mulf %165, %166 : vector<16x32xf32>
    %168 = vector.broadcast %147 : vector<1x32xf32> to vector<16x32xf32>
    %169 = arith.addf %167, %168 : vector<16x32xf32>
    %170 = arith.truncf %169 : vector<16x32xf32> to vector<16x32xbf16>
    %c6 = arith.constant 6 : index
    %c0_96 = arith.constant 0 : index
    %c0_97 = arith.constant 0 : index
    %171 = vector.load %arg4[%c6, %c0_96, %c0_97] : memref<12x32x16xbf16, #tpu.memory_space<vmem>>, vector<1x32x16xbf16>
    %172 = vector.shape_cast %171 : vector<1x32x16xbf16> to vector<32x16xbf16>
    %cst_98 = arith.constant dense<0.000000e+00> : vector<16x16xf32>
    %173 = tpu.matmul %170, %172, %cst_98 {dimension_numbers = #tpu.dot_dimension_numbers<[1], [0], [0], [1], [0, 0, 1, 1], [], []>} : vector<16x32xbf16>, vector<32x16xbf16>, vector<16x16xf32> -> vector<16x16xf32>
    %c6_99 = arith.constant 6 : index
    %c0_100 = arith.constant 0 : index
    %c0_101 = arith.constant 0 : index
    %174 = vector.load %arg5[%c6_99, %c0_100, %c0_101] : memref<12x1x16xf32, #tpu.memory_space<vmem>>, vector<1x1x16xf32>
    %175 = vector.shape_cast %174 : vector<1x1x16xf32> to vector<1x16xf32>
    %176 = vector.broadcast %175 : vector<1x16xf32> to vector<16x16xf32>
    %177 = arith.addf %173, %176 : vector<16x16xf32>
    %c8 = arith.constant 8 : index
    %c0_102 = arith.constant 0 : index
    %c0_103 = arith.constant 0 : index
    %178 = vector.load %arg4[%c8, %c0_102, %c0_103] : memref<12x32x16xbf16, #tpu.memory_space<vmem>>, vector<1x32x16xbf16>
    %179 = vector.shape_cast %178 : vector<1x32x16xbf16> to vector<32x16xbf16>
    %cst_104 = arith.constant dense<0.000000e+00> : vector<16x16xf32>
    %180 = tpu.matmul %170, %179, %cst_104 {dimension_numbers = #tpu.dot_dimension_numbers<[1], [0], [0], [1], [0, 0, 1, 1], [], []>} : vector<16x32xbf16>, vector<32x16xbf16>, vector<16x16xf32> -> vector<16x16xf32>
    %c8_105 = arith.constant 8 : index
    %c0_106 = arith.constant 0 : index
    %c0_107 = arith.constant 0 : index
    %181 = vector.load %arg5[%c8_105, %c0_106, %c0_107] : memref<12x1x16xf32, #tpu.memory_space<vmem>>, vector<1x1x16xf32>
    %182 = vector.shape_cast %181 : vector<1x1x16xf32> to vector<1x16xf32>
    %183 = vector.broadcast %182 : vector<1x16xf32> to vector<16x16xf32>
    %184 = arith.addf %180, %183 : vector<16x16xf32>
    %c10 = arith.constant 10 : index
    %c0_108 = arith.constant 0 : index
    %c0_109 = arith.constant 0 : index
    %185 = vector.load %arg4[%c10, %c0_108, %c0_109] : memref<12x32x16xbf16, #tpu.memory_space<vmem>>, vector<1x32x16xbf16>
    %186 = vector.shape_cast %185 : vector<1x32x16xbf16> to vector<32x16xbf16>
    %cst_110 = arith.constant dense<0.000000e+00> : vector<16x16xf32>
    %187 = tpu.matmul %170, %186, %cst_110 {dimension_numbers = #tpu.dot_dimension_numbers<[1], [0], [0], [1], [0, 0, 1, 1], [], []>} : vector<16x32xbf16>, vector<32x16xbf16>, vector<16x16xf32> -> vector<16x16xf32>
    %c10_111 = arith.constant 10 : index
    %c0_112 = arith.constant 0 : index
    %c0_113 = arith.constant 0 : index
    %188 = vector.load %arg5[%c10_111, %c0_112, %c0_113] : memref<12x1x16xf32, #tpu.memory_space<vmem>>, vector<1x1x16xf32>
    %189 = vector.shape_cast %188 : vector<1x1x16xf32> to vector<1x16xf32>
    %190 = vector.broadcast %189 : vector<1x16xf32> to vector<16x16xf32>
    %191 = arith.addf %187, %190 : vector<16x16xf32>
    %192 = vector.shape_cast %177 : vector<16x16xf32> to vector<2x8x16xf32>
    %193 = vector.shape_cast %184 : vector<16x16xf32> to vector<2x8x16xf32>
    %194 = vector.shape_cast %191 : vector<16x16xf32> to vector<2x8x16xf32>
    %c7 = arith.constant 7 : index
    %c0_114 = arith.constant 0 : index
    %c0_115 = arith.constant 0 : index
    %195 = vector.load %arg4[%c7, %c0_114, %c0_115] : memref<12x32x16xbf16, #tpu.memory_space<vmem>>, vector<1x32x16xbf16>
    %196 = vector.shape_cast %195 : vector<1x32x16xbf16> to vector<32x16xbf16>
    %cst_116 = arith.constant dense<0.000000e+00> : vector<16x16xf32>
    %197 = tpu.matmul %170, %196, %cst_116 {dimension_numbers = #tpu.dot_dimension_numbers<[1], [0], [0], [1], [0, 0, 1, 1], [], []>} : vector<16x32xbf16>, vector<32x16xbf16>, vector<16x16xf32> -> vector<16x16xf32>
    %c7_117 = arith.constant 7 : index
    %c0_118 = arith.constant 0 : index
    %c0_119 = arith.constant 0 : index
    %198 = vector.load %arg5[%c7_117, %c0_118, %c0_119] : memref<12x1x16xf32, #tpu.memory_space<vmem>>, vector<1x1x16xf32>
    %199 = vector.shape_cast %198 : vector<1x1x16xf32> to vector<1x16xf32>
    %200 = vector.broadcast %199 : vector<1x16xf32> to vector<16x16xf32>
    %201 = arith.addf %197, %200 : vector<16x16xf32>
    %c9 = arith.constant 9 : index
    %c0_120 = arith.constant 0 : index
    %c0_121 = arith.constant 0 : index
    %202 = vector.load %arg4[%c9, %c0_120, %c0_121] : memref<12x32x16xbf16, #tpu.memory_space<vmem>>, vector<1x32x16xbf16>
    %203 = vector.shape_cast %202 : vector<1x32x16xbf16> to vector<32x16xbf16>
    %cst_122 = arith.constant dense<0.000000e+00> : vector<16x16xf32>
    %204 = tpu.matmul %170, %203, %cst_122 {dimension_numbers = #tpu.dot_dimension_numbers<[1], [0], [0], [1], [0, 0, 1, 1], [], []>} : vector<16x32xbf16>, vector<32x16xbf16>, vector<16x16xf32> -> vector<16x16xf32>
    %c9_123 = arith.constant 9 : index
    %c0_124 = arith.constant 0 : index
    %c0_125 = arith.constant 0 : index
    %205 = vector.load %arg5[%c9_123, %c0_124, %c0_125] : memref<12x1x16xf32, #tpu.memory_space<vmem>>, vector<1x1x16xf32>
    %206 = vector.shape_cast %205 : vector<1x1x16xf32> to vector<1x16xf32>
    %207 = vector.broadcast %206 : vector<1x16xf32> to vector<16x16xf32>
    %208 = arith.addf %204, %207 : vector<16x16xf32>
    %c11 = arith.constant 11 : index
    %c0_126 = arith.constant 0 : index
    %c0_127 = arith.constant 0 : index
    %209 = vector.load %arg4[%c11, %c0_126, %c0_127] : memref<12x32x16xbf16, #tpu.memory_space<vmem>>, vector<1x32x16xbf16>
    %210 = vector.shape_cast %209 : vector<1x32x16xbf16> to vector<32x16xbf16>
    %cst_128 = arith.constant dense<0.000000e+00> : vector<16x16xf32>
    %211 = tpu.matmul %170, %210, %cst_128 {dimension_numbers = #tpu.dot_dimension_numbers<[1], [0], [0], [1], [0, 0, 1, 1], [], []>} : vector<16x32xbf16>, vector<32x16xbf16>, vector<16x16xf32> -> vector<16x16xf32>
    %c11_129 = arith.constant 11 : index
    %c0_130 = arith.constant 0 : index
    %c0_131 = arith.constant 0 : index
    %212 = vector.load %arg5[%c11_129, %c0_130, %c0_131] : memref<12x1x16xf32, #tpu.memory_space<vmem>>, vector<1x1x16xf32>
    %213 = vector.shape_cast %212 : vector<1x1x16xf32> to vector<1x16xf32>
    %214 = vector.broadcast %213 : vector<1x16xf32> to vector<16x16xf32>
    %215 = arith.addf %211, %214 : vector<16x16xf32>
    %216 = vector.shape_cast %201 : vector<16x16xf32> to vector<2x8x16xf32>
    %217 = vector.shape_cast %208 : vector<16x16xf32> to vector<2x8x16xf32>
    %218 = vector.shape_cast %215 : vector<16x16xf32> to vector<2x8x16xf32>
    %219 = tpu.concatenate %192, %216 in 0 : vector<2x8x16xf32>, vector<2x8x16xf32> -> vector<4x8x16xf32>
    %220 = arith.truncf %219 : vector<4x8x16xf32> to vector<4x8x16xbf16>
    %221 = tpu.concatenate %193, %217 in 0 : vector<2x8x16xf32>, vector<2x8x16xf32> -> vector<4x8x16xf32>
    %222 = arith.truncf %221 : vector<4x8x16xf32> to vector<4x8x16xbf16>
    %223 = tpu.concatenate %194, %218 in 0 : vector<2x8x16xf32>, vector<2x8x16xf32> -> vector<4x8x16xf32>
    %224 = arith.truncf %223 : vector<4x8x16xf32> to vector<4x8x16xbf16>
    "tpu.trace_start"() <{level = 10 : i32, message = "bqd,bkd->bqk"}> : () -> ()
    %cst_132 = arith.constant dense<0.000000e+00> : vector<4x8x8xf32>
    %225 = tpu.matmul %220, %222, %cst_132 {dimension_numbers = #tpu.dot_dimension_numbers<[2], [2], [1], [1], [0, 0, 0, 1, 1, 1], [0], [0]>} : vector<4x8x16xbf16>, vector<4x8x16xbf16>, vector<4x8x8xf32> -> vector<4x8x8xf32>
    "tpu.trace_stop"() : () -> ()
    %cst_133 = arith.constant dense<0xFF800000> : vector<4x8xf32>
    %226 = vector.multi_reduction <maximumf>, %225, %cst_133 [2] : vector<4x8x8xf32> to vector<4x8xf32>
    %227 = vector.shape_cast %226 : vector<4x8xf32> to vector<4x8x1xf32>
    %228 = vector.broadcast %227 : vector<4x8x1xf32> to vector<4x8x8xf32>
    %229 = arith.subf %225, %228 : vector<4x8x8xf32>
    %230 = math.exp %229 : vector<4x8x8xf32>
    %cst_134 = arith.constant dense<0.000000e+00> : vector<4x8xf32>
    %231 = vector.multi_reduction <add>, %230, %cst_134 [2] : vector<4x8x8xf32> to vector<4x8xf32>
    %232 = vector.shape_cast %231 : vector<4x8xf32> to vector<4x8x1xf32>
    %233 = tpu.reciprocal %232 {approx = true} : vector<4x8x1xf32> -> vector<4x8x1xf32>
    %234 = vector.broadcast %233 : vector<4x8x1xf32> to vector<4x8x8xf32>
    %235 = arith.mulf %230, %234 : vector<4x8x8xf32>
    %236 = arith.truncf %235 : vector<4x8x8xf32> to vector<4x8x8xbf16>
    "tpu.trace_start"() <{level = 10 : i32, message = "bqk,bkd->bqd"}> : () -> ()
    %cst_135 = arith.constant dense<0.000000e+00> : vector<4x8x16xf32>
    %237 = tpu.matmul %236, %224, %cst_135 {dimension_numbers = #tpu.dot_dimension_numbers<[2], [1], [1], [2], [0, 0, 0, 1, 1, 2], [0], [0]>} : vector<4x8x8xbf16>, vector<4x8x16xbf16>, vector<4x8x16xf32> -> vector<4x8x16xf32>
    %cst_136 = arith.constant 0.000000e+00 : f32
    "tpu.trace_stop"() : () -> ()
    %238 = vector.broadcast %cst_136 : f32 to vector<16x32xf32>
    %239 = vector.extract_strided_slice %237 {offsets = [0, 0, 0], sizes = [2, 8, 16], strides = [1, 1, 1]} : vector<4x8x16xf32> to vector<2x8x16xf32>
    %240 = vector.shape_cast %239 : vector<2x8x16xf32> to vector<16x16xf32>
    %241 = arith.truncf %240 : vector<16x16xf32> to vector<16x16xbf16>
    %c2_137 = arith.constant 2 : index
    %c0_138 = arith.constant 0 : index
    %c0_139 = arith.constant 0 : index
    %242 = vector.load %arg6[%c2_137, %c0_138, %c0_139] : memref<4x16x32xbf16, #tpu.memory_space<vmem>>, vector<1x16x32xbf16>
    %243 = vector.shape_cast %242 : vector<1x16x32xbf16> to vector<16x32xbf16>
    %cst_140 = arith.constant dense<0.000000e+00> : vector<16x32xf32>
    %244 = tpu.matmul %241, %243, %cst_140 {dimension_numbers = #tpu.dot_dimension_numbers<[1], [0], [0], [1], [0, 0, 1, 1], [], []>} : vector<16x16xbf16>, vector<16x32xbf16>, vector<16x32xf32> -> vector<16x32xf32>
    %245 = arith.addf %238, %244 : vector<16x32xf32>
    %246 = vector.extract_strided_slice %237 {offsets = [2, 0, 0], sizes = [2, 8, 16], strides = [1, 1, 1]} : vector<4x8x16xf32> to vector<2x8x16xf32>
    %247 = vector.shape_cast %246 : vector<2x8x16xf32> to vector<16x16xf32>
    %248 = arith.truncf %247 : vector<16x16xf32> to vector<16x16xbf16>
    %c3_141 = arith.constant 3 : index
    %c0_142 = arith.constant 0 : index
    %c0_143 = arith.constant 0 : index
    %249 = vector.load %arg6[%c3_141, %c0_142, %c0_143] : memref<4x16x32xbf16, #tpu.memory_space<vmem>>, vector<1x16x32xbf16>
    %250 = vector.shape_cast %249 : vector<1x16x32xbf16> to vector<16x32xbf16>
    %cst_144 = arith.constant dense<0.000000e+00> : vector<16x32xf32>
    %251 = tpu.matmul %248, %250, %cst_144 {dimension_numbers = #tpu.dot_dimension_numbers<[1], [0], [0], [1], [0, 0, 1, 1], [], []>} : vector<16x16xbf16>, vector<16x32xbf16>, vector<16x32xf32> -> vector<16x32xf32>
    %252 = arith.addf %245, %251 : vector<16x32xf32>
    %c6_145 = arith.constant 6 : index
    %c0_146 = arith.constant 0 : index
    %c0_147 = arith.constant 0 : index
    %253 = vector.load %arg10[%c6_145, %c0_146, %c0_147] : memref<12x1x32xf32, #tpu.memory_space<vmem>>, vector<1x1x32xf32>
    %254 = vector.shape_cast %253 : vector<1x1x32xf32> to vector<1x32xf32>
    %255 = vector.broadcast %254 : vector<1x32xf32> to vector<16x32xf32>
    %256 = arith.addf %252, %255 : vector<16x32xf32>
    %257 = arith.addf %169, %256 : vector<16x32xf32>
    %c8_148 = arith.constant 8 : index
    %c0_149 = arith.constant 0 : index
    %c0_150 = arith.constant 0 : index
    %258 = vector.load %arg10[%c8_148, %c0_149, %c0_150] : memref<12x1x32xf32, #tpu.memory_space<vmem>>, vector<1x1x32xf32>
    %259 = vector.shape_cast %258 : vector<1x1x32xf32> to vector<1x32xf32>
    %c9_151 = arith.constant 9 : index
    %c0_152 = arith.constant 0 : index
    %c0_153 = arith.constant 0 : index
    %260 = vector.load %arg10[%c9_151, %c0_152, %c0_153] : memref<12x1x32xf32, #tpu.memory_space<vmem>>, vector<1x1x32xf32>
    %261 = vector.shape_cast %260 : vector<1x1x32xf32> to vector<1x32xf32>
    %cst_154 = arith.constant dense<0.000000e+00> : vector<16xf32>
    %262 = vector.multi_reduction <add>, %257, %cst_154 [1] : vector<16x32xf32> to vector<16xf32>
    %263 = vector.shape_cast %262 : vector<16xf32> to vector<16x1xf32>
    %cst_155 = arith.constant 3.200000e+01 : f32
    %264 = vector.broadcast %cst_155 : f32 to vector<16x1xf32>
    %265 = arith.divf %263, %264 : vector<16x1xf32>
    %266 = vector.broadcast %265 : vector<16x1xf32> to vector<16x32xf32>
    %267 = arith.subf %257, %266 : vector<16x32xf32>
    %268 = arith.mulf %267, %267 : vector<16x32xf32>
    %cst_156 = arith.constant dense<0.000000e+00> : vector<16xf32>
    %269 = vector.multi_reduction <add>, %268, %cst_156 [1] : vector<16x32xf32> to vector<16xf32>
    %270 = vector.shape_cast %269 : vector<16xf32> to vector<16x1xf32>
    %cst_157 = arith.constant 3.200000e+01 : f32
    %271 = vector.broadcast %cst_157 : f32 to vector<16x1xf32>
    %272 = arith.divf %270, %271 : vector<16x1xf32>
    %273 = vector.broadcast %265 : vector<16x1xf32> to vector<16x32xf32>
    %274 = arith.subf %257, %273 : vector<16x32xf32>
    %cst_158 = arith.constant 9.99999974E-6 : f32
    %275 = vector.broadcast %cst_158 : f32 to vector<16x1xf32>
    %276 = arith.addf %272, %275 : vector<16x1xf32>
    %277 = math.rsqrt %276 : vector<16x1xf32>
    %278 = vector.broadcast %277 : vector<16x1xf32> to vector<16x32xf32>
    %279 = arith.mulf %274, %278 : vector<16x32xf32>
    %280 = vector.broadcast %259 : vector<1x32xf32> to vector<16x32xf32>
    %281 = arith.mulf %279, %280 : vector<16x32xf32>
    %282 = vector.broadcast %261 : vector<1x32xf32> to vector<16x32xf32>
    %283 = arith.addf %281, %282 : vector<16x32xf32>
    %284 = arith.truncf %283 : vector<16x32xf32> to vector<16x32xbf16>
    %c1_159 = arith.constant 1 : index
    %c0_160 = arith.constant 0 : index
    %c0_161 = arith.constant 0 : index
    %285 = vector.load %arg7[%c1_159, %c0_160, %c0_161] : memref<2x32x32xbf16, #tpu.memory_space<vmem>>, vector<1x32x32xbf16>
    %286 = vector.shape_cast %285 : vector<1x32x32xbf16> to vector<32x32xbf16>
    %cst_162 = arith.constant dense<0.000000e+00> : vector<16x32xf32>
    %287 = tpu.matmul %284, %286, %cst_162 {dimension_numbers = #tpu.dot_dimension_numbers<[1], [0], [0], [1], [0, 0, 1, 1], [], []>} : vector<16x32xbf16>, vector<32x32xbf16>, vector<16x32xf32> -> vector<16x32xf32>
    %c1_163 = arith.constant 1 : index
    %c0_164 = arith.constant 0 : index
    %c0_165 = arith.constant 0 : index
    %288 = vector.load %arg8[%c1_163, %c0_164, %c0_165] : memref<2x1x32xf32, #tpu.memory_space<vmem>>, vector<1x1x32xf32>
    %289 = vector.shape_cast %288 : vector<1x1x32xf32> to vector<1x32xf32>
    %290 = vector.broadcast %289 : vector<1x32xf32> to vector<16x32xf32>
    %291 = arith.addf %287, %290 : vector<16x32xf32>
    %cst_166 = arith.constant 0.000000e+00 : f32
    %292 = vector.broadcast %cst_166 : f32 to vector<16x32xf32>
    %293 = arith.maximumf %291, %292 : vector<16x32xf32>
    %294 = arith.truncf %293 : vector<16x32xf32> to vector<16x32xbf16>
    %c1_167 = arith.constant 1 : index
    %c0_168 = arith.constant 0 : index
    %c0_169 = arith.constant 0 : index
    %295 = vector.load %arg9[%c1_167, %c0_168, %c0_169] : memref<2x32x32xbf16, #tpu.memory_space<vmem>>, vector<1x32x32xbf16>
    %296 = vector.shape_cast %295 : vector<1x32x32xbf16> to vector<32x32xbf16>
    %cst_170 = arith.constant dense<0.000000e+00> : vector<16x32xf32>
    %297 = tpu.matmul %294, %296, %cst_170 {dimension_numbers = #tpu.dot_dimension_numbers<[1], [0], [0], [1], [0, 0, 1, 1], [], []>} : vector<16x32xbf16>, vector<32x32xbf16>, vector<16x32xf32> -> vector<16x32xf32>
    %c7_171 = arith.constant 7 : index
    %c0_172 = arith.constant 0 : index
    %c0_173 = arith.constant 0 : index
    %298 = vector.load %arg10[%c7_171, %c0_172, %c0_173] : memref<12x1x32xf32, #tpu.memory_space<vmem>>, vector<1x1x32xf32>
    %299 = vector.shape_cast %298 : vector<1x1x32xf32> to vector<1x32xf32>
    %300 = vector.broadcast %299 : vector<1x32xf32> to vector<16x32xf32>
    %301 = arith.addf %297, %300 : vector<16x32xf32>
    %302 = arith.addf %283, %301 : vector<16x32xf32>
    %c10_174 = arith.constant 10 : index
    %c0_175 = arith.constant 0 : index
    %c0_176 = arith.constant 0 : index
    %303 = vector.load %arg10[%c10_174, %c0_175, %c0_176] : memref<12x1x32xf32, #tpu.memory_space<vmem>>, vector<1x1x32xf32>
    %304 = vector.shape_cast %303 : vector<1x1x32xf32> to vector<1x32xf32>
    %c11_177 = arith.constant 11 : index
    %c0_178 = arith.constant 0 : index
    %c0_179 = arith.constant 0 : index
    %305 = vector.load %arg10[%c11_177, %c0_178, %c0_179] : memref<12x1x32xf32, #tpu.memory_space<vmem>>, vector<1x1x32xf32>
    %306 = vector.shape_cast %305 : vector<1x1x32xf32> to vector<1x32xf32>
    %cst_180 = arith.constant dense<0.000000e+00> : vector<16xf32>
    %307 = vector.multi_reduction <add>, %302, %cst_180 [1] : vector<16x32xf32> to vector<16xf32>
    %308 = vector.shape_cast %307 : vector<16xf32> to vector<16x1xf32>
    %cst_181 = arith.constant 3.200000e+01 : f32
    %309 = vector.broadcast %cst_181 : f32 to vector<16x1xf32>
    %310 = arith.divf %308, %309 : vector<16x1xf32>
    %311 = vector.broadcast %310 : vector<16x1xf32> to vector<16x32xf32>
    %312 = arith.subf %302, %311 : vector<16x32xf32>
    %313 = arith.mulf %312, %312 : vector<16x32xf32>
    %cst_182 = arith.constant dense<0.000000e+00> : vector<16xf32>
    %314 = vector.multi_reduction <add>, %313, %cst_182 [1] : vector<16x32xf32> to vector<16xf32>
    %315 = vector.shape_cast %314 : vector<16xf32> to vector<16x1xf32>
    %cst_183 = arith.constant 3.200000e+01 : f32
    %316 = vector.broadcast %cst_183 : f32 to vector<16x1xf32>
    %317 = arith.divf %315, %316 : vector<16x1xf32>
    %318 = vector.broadcast %310 : vector<16x1xf32> to vector<16x32xf32>
    %319 = arith.subf %302, %318 : vector<16x32xf32>
    %cst_184 = arith.constant 9.99999974E-6 : f32
    %320 = vector.broadcast %cst_184 : f32 to vector<16x1xf32>
    %321 = arith.addf %317, %320 : vector<16x1xf32>
    %322 = math.rsqrt %321 : vector<16x1xf32>
    %323 = vector.broadcast %322 : vector<16x1xf32> to vector<16x32xf32>
    %324 = arith.mulf %319, %323 : vector<16x32xf32>
    %325 = vector.broadcast %304 : vector<1x32xf32> to vector<16x32xf32>
    %326 = arith.mulf %324, %325 : vector<16x32xf32>
    %327 = vector.broadcast %306 : vector<1x32xf32> to vector<16x32xf32>
    %328 = arith.addf %326, %327 : vector<16x32xf32>
    %329 = vector.shape_cast %328 : vector<16x32xf32> to vector<2x8x32xf32>
    %cst_185 = arith.constant dense<0.000000e+00> : vector<2x32xf32>
    %330 = vector.multi_reduction <add>, %329, %cst_185 [1] : vector<2x8x32xf32> to vector<2x32xf32>
    %cst_186 = arith.constant 8.000000e+00 : f32
    %331 = vector.broadcast %cst_186 : f32 to vector<2x32xf32>
    %332 = arith.divf %330, %331 : vector<2x32xf32>
    %c0_187 = arith.constant 0 : index
    %c0_188 = arith.constant 0 : index
    %333 = vector.load %arg11[%c0_187, %c0_188] : memref<32x1xf32, #tpu.memory_space<vmem>>, vector<32x1xf32>
    %cst_189 = arith.constant dense<0.000000e+00> : vector<2x1xf32>
    %334 = tpu.matmul %332, %333, %cst_189 {dimension_numbers = #tpu.dot_dimension_numbers<[1], [0], [0], [1], [0, 0, 1, 1], [], []>} : vector<2x32xf32>, vector<32x1xf32>, vector<2x1xf32> -> vector<2x1xf32>
    %c0_190 = arith.constant 0 : index
    %c0_191 = arith.constant 0 : index
    %335 = vector.load %arg12[%c0_190, %c0_191] : memref<1x1xf32, #tpu.memory_space<vmem>>, vector<1x1xf32>
    %336 = vector.broadcast %335 : vector<1x1xf32> to vector<2x1xf32>
    %337 = arith.addf %334, %336 : vector<2x1xf32>
    %c0_192 = arith.constant 0 : index
    %c0_193 = arith.constant 0 : index
    %338 = vector.load %arg13[%c0_192, %c0_193] : memref<2x1xf32, #tpu.memory_space<vmem>>, vector<2x1xf32>
    tpu.vector_store %arg13[%c0_192, %c0_193], %337 {strides = array<i32>} : memref<2x1xf32, #tpu.memory_space<vmem>>, vector<2x1xf32>,
    return
  }
  func.func @transform_0(%arg0: i32) -> (i32, i32, i32) {
    %c0_i32 = arith.constant 0 : i32
    %c0_i32_0 = arith.constant 0 : i32
    %c0_i32_1 = arith.constant 0 : i32
    return %arg0, %c0_i32, %c0_i32_0 : i32, i32, i32
  }
  func.func @transform_1(%arg0: i32) -> (i32, i32) {
    %c0_i32 = arith.constant 0 : i32
    %c0_i32_0 = arith.constant 0 : i32
    %c0_i32_1 = arith.constant 0 : i32
    return %c0_i32, %c0_i32_0 : i32, i32
  }
  func.func @transform_2(%arg0: i32) -> (i32, i32) {
    %c0_i32 = arith.constant 0 : i32
    %c0_i32_0 = arith.constant 0 : i32
    %c0_i32_1 = arith.constant 0 : i32
    return %c0_i32, %c0_i32_0 : i32, i32
  }
  func.func @transform_3(%arg0: i32) -> (i32, i32, i32) {
    %c0_i32 = arith.constant 0 : i32
    %c0_i32_0 = arith.constant 0 : i32
    %c0_i32_1 = arith.constant 0 : i32
    %c0_i32_2 = arith.constant 0 : i32
    return %c0_i32, %c0_i32_0, %c0_i32_1 : i32, i32, i32
  }
  func.func @transform_4(%arg0: i32) -> (i32, i32, i32) {
    %c0_i32 = arith.constant 0 : i32
    %c0_i32_0 = arith.constant 0 : i32
    %c0_i32_1 = arith.constant 0 : i32
    %c0_i32_2 = arith.constant 0 : i32
    return %c0_i32, %c0_i32_0, %c0_i32_1 : i32, i32, i32
  }
  func.func @transform_5(%arg0: i32) -> (i32, i32, i32) {
    %c0_i32 = arith.constant 0 : i32
    %c0_i32_0 = arith.constant 0 : i32
    %c0_i32_1 = arith.constant 0 : i32
    %c0_i32_2 = arith.constant 0 : i32
    return %c0_i32, %c0_i32_0, %c0_i32_1 : i32, i32, i32
  }
  func.func @transform_6(%arg0: i32) -> (i32, i32, i32) {
    %c0_i32 = arith.constant 0 : i32
    %c0_i32_0 = arith.constant 0 : i32
    %c0_i32_1 = arith.constant 0 : i32
    %c0_i32_2 = arith.constant 0 : i32
    return %c0_i32, %c0_i32_0, %c0_i32_1 : i32, i32, i32
  }
  func.func @transform_7(%arg0: i32) -> (i32, i32, i32) {
    %c0_i32 = arith.constant 0 : i32
    %c0_i32_0 = arith.constant 0 : i32
    %c0_i32_1 = arith.constant 0 : i32
    %c0_i32_2 = arith.constant 0 : i32
    return %c0_i32, %c0_i32_0, %c0_i32_1 : i32, i32, i32
  }
  func.func @transform_8(%arg0: i32) -> (i32, i32, i32) {
    %c0_i32 = arith.constant 0 : i32
    %c0_i32_0 = arith.constant 0 : i32
    %c0_i32_1 = arith.constant 0 : i32
    %c0_i32_2 = arith.constant 0 : i32
    return %c0_i32, %c0_i32_0, %c0_i32_1 : i32, i32, i32
  }
  func.func @transform_9(%arg0: i32) -> (i32, i32, i32) {
    %c0_i32 = arith.constant 0 : i32
    %c0_i32_0 = arith.constant 0 : i32
    %c0_i32_1 = arith.constant 0 : i32
    %c0_i32_2 = arith.constant 0 : i32
    return %c0_i32, %c0_i32_0, %c0_i32_1 : i32, i32, i32
  }
  func.func @transform_10(%arg0: i32) -> (i32, i32) {
    %c0_i32 = arith.constant 0 : i32
    %c0_i32_0 = arith.constant 0 : i32
    %c0_i32_1 = arith.constant 0 : i32
    return %c0_i32, %c0_i32_0 : i32, i32
  }
  func.func @transform_11(%arg0: i32) -> (i32, i32) {
    %c0_i32 = arith.constant 0 : i32
    %c0_i32_0 = arith.constant 0 : i32
    %c0_i32_1 = arith.constant 0 : i32
    return %c0_i32, %c0_i32_0 : i32, i32
  }
  func.func @transform_12(%arg0: i32) -> (i32, i32) {
    %c0_i32 = arith.constant 0 : i32
    %c0_i32_0 = arith.constant 0 : i32
    return %arg0, %c0_i32 : i32, i32
  }
}

</mosaic_0001>

<bundles_post_ra>
// kernel: transformer_discriminator_forward.1
= control target key start
LH: loop header
LB: loop body
LE: loop exit
PB: predicated region body
PF: predicated region fallthrough
CT: control target
= control target key end

     0   :  { %v3208_v0 = vmov 0.0   ;;  %vm3209_vm0 = vmmov 0   ;;  %vm55_vm1 = vcmask 130048   ;;  %vm127_vm2 = vcmask 261120   ;;  %s3740_s1 = inlined_call_operand.vmem [shape: bf16[16,32], index: 1, kind: input, shape index: {}]   ;;  %s3741_s0 = inlined_call_operand.vmem [shape: f32[2,8,16], index: 0, kind: input, shape index: {}]   ;;  %s3742_s3 = inlined_call_operand.vmem [shape: bf16[12,32,16], index: 3, kind: input, shape index: {}]   ;;  %s3743_s2 = inlined_call_operand.vmem [shape: f32[8,32], index: 2, kind: input, shape index: {}]   ;;  %s3744_s4 = inlined_call_operand.vmem [shape: f32[12,1,16], index: 4, kind: input, shape index: {}]   ;;  %s3745_s5 = inlined_call_operand.vmem [shape: bf16[4,16,32], index: 5, kind: input, shape index: {}]   ;;  %s3746_s9 = inlined_call_operand.vmem [shape: f32[12,1,32], index: 9, kind: input, shape index: {}]   ;;  %s3747_s6 = inlined_call_operand.vmem [shape: bf16[2,32,32], index: 6, kind: input, shape index: {}]   ;;  %s3748_s8 = inlined_call_operand.vmem [shape: bf16[2,32,32], index: 8, kind: input, shape index: {}]   ;;  %s3749_s7 = inlined_call_operand.vmem [shape: f32[2,1,32], index: 7, kind: input, shape index: {}]   ;;  %s3750_s10 = inlined_call_operand.vmem [shape: f32[32,1], index: 10, kind: input, shape index: {}]   ;;  %s3751_s11 = inlined_call_operand.<no memory space> [shape: f32[1,1], index: 11, kind: input, shape index: {}]   ;;  %s3752_s12 = inlined_call_operand.vmem [shape: f32[2,1], index: 12, kind: output, shape index: {}]  }
   0x1   :  { %2856 = vmatprep.subr.bf16.mxu0 %v3208_v0  ;;  %v3123_v1 = vld [vmem:[%s3740_s1] sm:$0xff]   ;;  %2858 = vmatprep.mubr.msk.bf16.mxu0 %vm3209_vm0, %v3208_v0  ;;  %v45_v3 = vld [vmem:[%s3741_s0 + $0x8] sm:$0xff]  ;;  %v3129_v17 = vld [vmem:[%s3742_s3 + $0x18] sm:$0xff]   ;;  %vm750_vm3 = vcmask 1043456   ;;  %vm698_vm4 = vcmask 64512   ;;  %vm2498_vm5 = vcmask 1041409  }
   0x2   :  { %v44_v2 = vld [vmem:[%s3741_s0] sm:$0xff]  ;;  %2862 = vmatprep.subr.bf16.mxu1 %v3208_v0  ;;  %2866 = vmatprep.mubr.msk.bf16.mxu1 %vm3209_vm0, %v3208_v0  ;;  %v3124_v5 = vld [vmem:[%s3742_s3 + $0x8] sm:$0xff]   ;;  %v3131_v20 = vld [vmem:[%s3742_s3 + $0x10] sm:$0xff]   ;;  %vm2572_vm6 = vcmask 1024  }
   0x3   :  { %2857 = vmatpush3.bf16.msra.mxu0 %v3123_v1  ;;  %v46_v4 = vpack.c.bf16 %v45_v3, %v44_v2  ;;  %v3125_v6 = vld [vmem:[%s3742_s3 + $0x28] sm:$0xff]   ;;  %2863 = vmatpush3.bf16.msra.mxu1 %v3124_v5  ;;  %v3126_v7 = vld [vmem:[%s3742_s3] sm:$0xff]   ;;  %v3132_v21 = vld [vmem:[%s3742_s3 + $0x38] sm:$0xff]  }
   0x4   :  { %2870 = vmatprep.subr.bf16.mxu0 %v3208_v0  ;;  %2864 = vmatprep.subr.bf16.mxu1 %v3208_v0  ;;  %v3127_v8 = vld [vmem:[%s3742_s3 + $0x20] sm:$0xff]   ;;  %v3128_v16 = vld [vmem:[%s3742_s3 + $0x48] sm:$0xff]   ;;  %v3133_v22 = vld [vmem:[%s3742_s3 + $0x58] sm:$0xff]  }
   0x5   :  { %v100_v10 = vld [vmem:[%s3743_s2] sm:$0xff]  ;;  %v3134_v23 = vld [vmem:[%s3742_s3 + $0x30] sm:$0xff]  }
   0x6   :  { %2859 = vmatmul.mubr.msk.bf16.vlgmr.msra.gmra.mxu0 %vm55_vm1, %v46_v4  ;;  %v3130_v19 = vld [vmem:[%s3742_s3 + $0x40] sm:$0xff]   ;;  %v3135_v24 = vld [vmem:[%s3742_s3 + $0x50] sm:$0xff]  }
   0x7   :  { %2874 = vmatprep.mubr.msk.bf16.mxu0 %vm3209_vm0, %v3208_v0  ;;  %2871 = vmatpush3.bf16.msra.mxu0 %v3125_v6  ;;  %v2589_v25 = vld [vmem:[%s3744_s4 + $0x2] ss:$0 sm:$0xff]  ;;  %v2580_v32 = vld [vmem:[%s3744_s4] ss:$0 sm:$0xff]  ;;  %v2616_v52 = vld [vmem:[%s3744_s4 + $0x3] ss:$0 sm:$0xff] }
   0x8   :  { %2872 = vmatprep.subr.bf16.mxu0 %v3208_v0  ;;  %2865 = vmatpush3.bf16.msra.mxu1 %v3126_v7  ;;  %v2598_v57 = vld [vmem:[%s3744_s4 + $0x4] ss:$0 sm:$0xff]  ;;  %v2607_v61 = vld [vmem:[%s3744_s4 + $0x1] ss:$0 sm:$0xff] }
   0x9   :  { %2878 = vmatprep.subr.bf16.mxu1 %v3208_v0 }
   0xb   :  { %2873 = vmatpush3.bf16.msra.mxu0 %v3127_v8 }
   0xc   :  { %2886 = vmatprep.subr.bf16.mxu0 %v3208_v0 }
  0xc6   :  { %v93_v9 = vpop.f32.mrf.mxu0 }
  0xc7   :  { %v3313_v13 = vadd.f32 %v100_v10, %v93_v9 }
  0xc8   :  { %v2860_v11 = vpop.f32.mrf.mxu0 }
  0xca   :  { %v96_v12 = vpop.f32.mrf.mxu0 }
  0xcb   :  { %v3315_v14 = vadd.f32 %v100_v10, %v96_v12 }
  0xcc   :  { %v2861_v15 = vpop.f32.mrf.mxu0 }
  0xcd   :  { %v103_v18 = vpack.c.bf16 %v3315_v14, %v3313_v13 }
  0xcf   :  { %2867 = vmatmul.mubr.msk.bf16.vlgmr.msra.gmra.mxu1 %vm127_vm2, %v103_v18  ;;  %2875 = vmatmul.mubr.msk.bf16.vlgmr.msra.gmra.mxu0 %vm127_vm2, %v103_v18 }
  0xd0   :  { %2879 = vmatpush3.bf16.msra.mxu1 %v3128_v16  ;;  %2887 = vmatpush3.bf16.msra.mxu0 %v3129_v17 }
  0xd1   :  { %2880 = vmatprep.subr.bf16.mxu1 %v3208_v0  ;;  %2888 = vmatprep.subr.bf16.mxu0 %v3208_v0 }
  0xd2   :  { %2882 = vmatprep.mubr.msk.bf16.mxu1 %vm3209_vm0, %v3208_v0  ;;  %2890 = vmatprep.mubr.msk.bf16.mxu0 %vm3209_vm0, %v3208_v0 }
  0xd4   :  { %2881 = vmatpush3.bf16.msra.mxu1 %v3130_v19  ;;  %2889 = vmatpush3.bf16.msra.mxu0 %v3131_v20 }
  0xd5   :  { %2894 = vmatprep.subr.bf16.mxu1 %v3208_v0  ;;  %2902 = vmatprep.subr.bf16.mxu0 %v3208_v0 }
  0xd7   :  { %2883 = vmatmul.mubr.msk.bf16.vlgmr.msra.gmra.mxu1 %vm127_vm2, %v103_v18  ;;  %2891 = vmatmul.mubr.msk.bf16.vlgmr.msra.gmra.mxu0 %vm127_vm2, %v103_v18 }
  0xd8   :  { %2895 = vmatpush3.bf16.msra.mxu1 %v3132_v21  ;;  %2903 = vmatpush3.bf16.msra.mxu0 %v3133_v22 }
  0xd9   :  { %2896 = vmatprep.subr.bf16.mxu1 %v3208_v0  ;;  %2904 = vmatprep.subr.bf16.mxu0 %v3208_v0 }
  0xda   :  { %2898 = vmatprep.mubr.msk.bf16.mxu1 %vm3209_vm0, %v3208_v0  ;;  %2906 = vmatprep.mubr.msk.bf16.mxu0 %vm3209_vm0, %v3208_v0 }
  0xdc   :  { %2897 = vmatpush3.bf16.msra.mxu1 %v3134_v23  ;;  %2905 = vmatpush3.bf16.msra.mxu0 %v3135_v24 }
  0xdd   :  { %2910 = vmatprep.subr.bf16.mxu1 %v3208_v0  ;;  %2916 = vmatprep.subr.bf16.mxu0 %v3208_v0 }
  0xdf   :  { %2899 = vmatmul.mubr.msk.bf16.vlgmr.msra.gmra.mxu1 %vm127_vm2, %v103_v18  ;;  %2907 = vmatmul.mubr.msk.bf16.vlgmr.msra.gmra.mxu0 %vm127_vm2, %v103_v18 }
  0xe0   :  { %2912 = vmatprep.mubr.msk.bf16.mxu1 %vm3209_vm0, %v3208_v0  ;;  %2918 = vmatprep.mubr.msk.bf16.mxu0 %vm3209_vm0, %v3208_v0 }
 0x18f   :  { %v165_v26 = vpop.f32.mrf.mxu1  ;;  %v231_v27 = vpop.f32.mrf.mxu0 }
 0x190   :  { %v232_v28 = vadd.f32 %v2589_v25, %v231_v27  ;;  %v166_v39 = vadd.f32 %v2580_v32, %v165_v26 }
 0x191   :  { %v2868_v29 = vpop.f32.mrf.mxu1  ;;  %v2876_v30 = vpop.f32.mrf.mxu0 }
 0x192   :  { %v506_v31 = vpack.c.bf16 %v232_v28, %v232_v28  ;;  %v502_v46 = vpack.c.bf16 %v166_v39, %v166_v39 }
 0x193   :  { %v168_v33 = vpop.f32.mrf.mxu1  ;;  %v234_v34 = vpop.f32.mrf.mxu0 }
 0x194   :  { %v518_v35 = vsel %vm55_vm1, %v506_v31, 0  ;;  %v235_v36 = vadd.f32 %v2589_v25, %v234_v34  ;;  %v169_v47 = vadd.f32 %v2580_v32, %v168_v33 }
 0x195   :  { %v2869_v37 = vpop.f32.mrf.mxu1  ;;  %v2877_v38 = vpop.f32.mrf.mxu0  ;;  %2911 = vmatpush3.bf16.xpose.msra.mxu1 %v518_v35 }
 0x196   :  { %v507_v40 = vpack.c.bf16 %v235_v36, %v235_v36  ;;  %2922 = vmatprep.subr.bf16.mxu1 %v3208_v0  ;;  %v503_v53 = vpack.c.bf16 %v169_v47, %v169_v47 }
 0x197   :  { %v297_v41 = vpop.f32.mrf.mxu1  ;;  %v363_v42 = vpop.f32.mrf.mxu0 }
 0x198   :  { %v564_v43 = vsel %vm55_vm1, %v507_v40, 0  ;;  %v298_v1 = vadd.f32 %v2598_v57, %v297_v41  ;;  %v364_v6 = vadd.f32 %v2607_v61, %v363_v42 }
 0x199   :  { %v2884_v44 = vpop.f32.mrf.mxu1  ;;  %v2892_v45 = vpop.f32.mrf.mxu0  ;;  %2917 = vmatpush3.bf16.xpose.msra.mxu0 %v564_v43 }
 0x19a   :  { %2928 = vmatprep.subr.bf16.mxu0 %v3208_v0  ;;  %v510_v8 = vpack.c.bf16 %v298_v1, %v298_v1  ;;  %v504_v11 = vpack.c.bf16 %v364_v6, %v364_v6 }
 0x19b   :  { %v300_v48 = vpop.f32.mrf.mxu1  ;;  %v366_v49 = vpop.f32.mrf.mxu0 }
 0x19c   :  { %2913 = vmatmul.mubr.msk.bf16.vlgmr.msra.gmra.mxu1 %vm55_vm1, %v502_v46  ;;  %v301_v9 = vadd.f32 %v2598_v57, %v300_v48  ;;  %v367_v12 = vadd.f32 %v2607_v61, %v366_v49  ;;  %v752_v15 = vsel %vm750_vm3, %v510_v8, 0 }
 0x19d   :  { %v2885_v50 = vpop.f32.mrf.mxu1  ;;  %v2893_v51 = vpop.f32.mrf.mxu0  ;;  %2924 = vmatprep.mubr.msk.bf16.mxu1 %vm3209_vm0, %v3208_v0 }
 0x19e   :  { %v511_v16 = vpack.c.bf16 %v301_v9, %v301_v9  ;;  %v505_v17 = vpack.c.bf16 %v367_v12, %v367_v12 }
 0x19f   :  { %v429_v54 = vpop.f32.mrf.mxu1  ;;  %v3385_v55 = vpop.f32.mrf.mxu0 }
 0x1a0   :  { %v430_v56 = vadd.f32 %v2616_v52, %v429_v54  ;;  %2919 = vmatmul.mubr.msk.bf16.vlgmr.msra.gmra.mxu0 %vm55_vm1, %v503_v53  ;;  %v798_v18 = vsel %vm750_vm3, %v511_v16, 0 }
 0x1a1   :  { %v2900_v58 = vpop.f32.mrf.mxu1  ;;  %v2908_v59 = vpop.f32.mrf.mxu0  ;;  %2930 = vmatprep.mubr.msk.bf16.mxu0 %vm3209_vm0, %v3208_v0 }
 0x1a2   :  { %v508_v60 = vpack.c.bf16 %v430_v56, %v430_v56 }
 0x1a3   :  { %v432_v62 = vpop.f32.mrf.mxu1  ;;  %v3396_v63 = vpop.f32.mrf.mxu0 }
 0x1a4   :  { %v610_v2 = vsel %vm55_vm1, %v508_v60, 0  ;;  %v433_v3 = vadd.f32 %v2616_v52, %v432_v62  ;;  %v2625_v62 = vld [vmem:[%s3744_s4 + $0x5] ss:$0 sm:$0xff] }
 0x1a5   :  { %v2901_v4 = vpop.f32.mrf.mxu1  ;;  %v2909_v5 = vpop.f32.mrf.mxu0  ;;  %2923 = vmatpush3.bf16.xpose.msra.mxu1 %v610_v2  ;;  %v496_v1 = vadd.f32 %v2625_v62, %v3385_v55 }
 0x1a6   :  { %v509_v7 = vpack.c.bf16 %v433_v3, %v433_v3  ;;  %2934 = vmatprep.subr.bf16.mxu1 %v3208_v0  ;;  %v499_v4 = vadd.f32 %v2625_v62, %v3396_v63 }
 0x1a7   :  { %v512_v3 = vpack.c.bf16 %v496_v1, %v496_v1 }
 0x1a8   :  { %v656_v10 = vsel %vm55_vm1, %v509_v7, 0 }
 0x1a9   :  { %2929 = vmatpush3.bf16.xpose.msra.mxu0 %v656_v10  ;;  %v844_v9 = vsel %vm750_vm3, %v512_v3, 0  ;;  %v513_v10 = vpack.c.bf16 %v499_v4, %v499_v4 }
 0x1aa   :  { %2940 = vmatprep.subr.bf16.mxu0 %v3208_v0 }
 0x1ab   :  { %v890_v63 = vsel %vm750_vm3, %v513_v10, 0 }
 0x1ac   :  { %2925 = vmatmul.mubr.msk.bf16.vlgmr.msra.gmra.mxu1 %vm55_vm1, %v504_v11 }
 0x1ad   :  { %2935 = vmatpush3.bf16.msra.mxu1 %v752_v15  ;;  %2936 = vmatprep.mubr.msk.bf16.mxu1 %vm3209_vm0, %v3208_v0 }
 0x1ae   :  { %2946 = vmatprep.subr.bf16.mxu1 %v3208_v0 }
 0x1b0   :  { %2931 = vmatmul.mubr.msk.bf16.vlgmr.msra.gmra.mxu0 %vm55_vm1, %v505_v17 }
 0x1b1   :  { %2941 = vmatpush3.bf16.msra.mxu0 %v798_v18  ;;  %2942 = vmatprep.mubr.msk.bf16.mxu0 %vm3209_vm0, %v3208_v0 }
 0x1b2   :  { %2952 = vmatprep.subr.bf16.mxu0 %v3208_v0 }
 0x25c   :  { %v554_v19 = vpop.f32.mrf.mxu1 }
 0x25d   :  { %v699_v20 = vsel %vm698_vm4, %v554_v19, -inf }
 0x25e   :  { %700 = vmax.xlane.f32.xlu0 %v699_v20  ;;  %v2914_v21 = vpop.f32.mrf.mxu1 }
 0x25f   :  { %v3136_v21 = vld [vmem:[%s3745_s5] sm:$0xff]  }
 0x260   :  { %v557_v22 = vpop.f32.mrf.mxu1  ;;  %v600_v23 = vpop.f32.mrf.mxu0 }
 0x261   :  { %v702_v24 = vsel %vm698_vm4, %v600_v23, -inf  ;;  %v3137_v22 = vld [vmem:[%s3745_s5 + $0x8] sm:$0xff]  }
 0x262   :  { %v2915_v25 = vpop.f32.mrf.mxu1  ;;  %703 = vmax.xlane.f32.xlu0 %v702_v24  ;;  %v2920_v26 = vpop.f32.mrf.mxu0 }
 0x264   :  { %v603_v27 = vpop.f32.mrf.mxu0 }
 0x266   :  { %v2921_v28 = vpop.f32.mrf.mxu0 }
 0x26c   :  { %v646_v29 = vpop.f32.mrf.mxu1 }
 0x26d   :  { %v705_v30 = vsel %vm698_vm4, %v646_v29, -inf }
 0x26e   :  { %706 = vmax.xlane.f32.xlu1 %v705_v30  ;;  %v2926_v31 = vpop.f32.mrf.mxu1 }
 0x270   :  { %v649_v32 = vpop.f32.mrf.mxu1  ;;  %v692_v33 = vpop.f32.mrf.mxu0 }
 0x271   :  { %v708_v34 = vsel %vm698_vm4, %v692_v33, -inf }
 0x272   :  { %v2927_v35 = vpop.f32.mrf.mxu1  ;;  %709 = vmax.xlane.f32.xlu1 %v708_v34  ;;  %v2932_v36 = vpop.f32.mrf.mxu0 }
 0x274   :  { %v695_v37 = vpop.f32.mrf.mxu0 }
 0x276   :  { %v2933_v38 = vpop.f32.mrf.mxu0 }
 0x2e7   :  { %v701_v39 = vpop.xlane.xlu0 %700 }
 0x2e8   :  { %v711_v40 = vsub.f32 %v554_v19, %v701_v39 }
 0x2ea   :  { %v715_v41 = vmul.f32 1.442695, %v711_v40 }
 0x2eb   :  { %v704_v42 = vpop.xlane.xlu0 %703 }
 0x2ec   :  { %3160 = vpow2.f32 %v715_v41  ;;  %v712_v43 = vsub.f32 %v600_v23, %v704_v42 }
 0x2ee   :  { %v717_v44 = vmul.f32 1.442695, %v712_v43 }
 0x2f0   :  { %3162 = vpow2.f32 %v717_v44 }
 0x2f7   :  { %v707_v45 = vpop.xlane.xlu1 %706 }
 0x2f8   :  { %v713_v46 = vsub.f32 %v646_v29, %v707_v45 }
 0x2f9   :  { %v3161_v47 = vpop.eup %3160 }
 0x2fa   :  { %v719_v48 = vmul.f32 1.442695, %v713_v46  ;;  %v723_v49 = vsel %vm698_vm4, %v3161_v47, 0.0  ;;  %v2643_v46 = vld [vmem:[%s3746_s9] ss:$0 sm:$0xff] }
 0x2fb   :  { %724 = vadd.xlane.f32.xlu0 %v723_v49  ;;  %v710_v50 = vpop.xlane.xlu1 %709 }
 0x2fc   :  { %3164 = vpow2.f32 %v719_v48  ;;  %v714_v51 = vsub.f32 %v692_v33, %v710_v50 }
 0x2fd   :  { %v3163_v52 = vpop.eup %3162 }
 0x2fe   :  { %v721_v53 = vmul.f32 1.442695, %v714_v51  ;;  %v726_v54 = vsel %vm698_vm4, %v3163_v52, 0.0 }
 0x2ff   :  { %727 = vadd.xlane.f32.xlu1 %v726_v54 }
 0x300   :  { %3166 = vpow2.f32 %v721_v53 }
 0x309   :  { %v3165_v56 = vpop.eup %3164 }
 0x30a   :  { %v729_v57 = vsel %vm698_vm4, %v3165_v56, 0.0 }
 0x30b   :  { %730 = vadd.xlane.f32.xlu0 %v729_v57 }
 0x30d   :  { %v3167_v58 = vpop.eup %3166 }
 0x30e   :  { %v732_v59 = vsel %vm698_vm4, %v3167_v58, 0.0 }
 0x30f   :  { %733 = vadd.xlane.f32.xlu1 %v732_v59 }
 0x384   :  { %v725_v60 = vpop.xlane.xlu0 %724 }
 0x385   :  { %3168 = vrcp.f32 %v725_v60 }
 0x388   :  { %v728_v61 = vpop.xlane.xlu1 %727 }
 0x389   :  { %3170 = vrcp.f32 %v728_v61 }
 0x392   :  { %v3169_v2 = vpop.eup %3168 }
 0x393   :  { %v739_v5 = vmul.f32 %v3169_v2, %v3161_v47 }
 0x394   :  { %v731_v6 = vpop.xlane.xlu0 %730 }
 0x395   :  { %3172 = vrcp.f32 %v731_v6  ;;  %v743_v7 = vpack.c.bf16 %v739_v5, %v739_v5  ;;  %v3139_v6 = vld [vmem:[%s3747_s6] sm:$0xff]  }
 0x396   :  { %v3171_v8 = vpop.eup %3170 }
 0x397   :  { %2937 = vmatmul.mubr.msk.bf16.vlgmr.msra.gmra.mxu1 %vm698_vm4, %v743_v7  ;;  %v740_v11 = vmul.f32 %v3171_v8, %v3163_v52 }
 0x398   :  { %2947 = vmatpush3.bf16.msra.mxu1 %v844_v9  ;;  %v734_v12 = vpop.xlane.xlu1 %733  ;;  %2948 = vmatprep.mubr.msk.bf16.mxu1 %vm3209_vm0, %v3208_v0 }
 0x399   :  { %3174 = vrcp.f32 %v734_v12  ;;  %v744_v55 = vpack.c.bf16 %v740_v11, %v740_v11  ;;  %2958 = vmatprep.subr.bf16.mxu1 %v3208_v0 }
 0x39b   :  { %2943 = vmatmul.mubr.msk.bf16.vlgmr.msra.gmra.mxu0 %vm698_vm4, %v744_v55 }
 0x39c   :  { %2953 = vmatpush3.bf16.msra.mxu0 %v890_v63  ;;  %2954 = vmatprep.mubr.msk.bf16.mxu0 %vm3209_vm0, %v3208_v0 }
 0x39d   :  { %2964 = vmatprep.subr.bf16.mxu0 %v3208_v0 }
 0x3a2   :  { %v3173_v15 = vpop.eup %3172 }
 0x3a3   :  { %v741_v16 = vmul.f32 %v3173_v15, %v3165_v56  ;;  %v2646_v15 = vld [vmem:[%s3746_s9 + $0x2] ss:$0 sm:$0xff] }
 0x3a5   :  { %v745_v17 = vpack.c.bf16 %v741_v16, %v741_v16 }
 0x3a6   :  { %v3175_v18 = vpop.eup %3174 }
 0x3a7   :  { %2949 = vmatmul.mubr.msk.bf16.vlgmr.msra.gmra.mxu1 %vm698_vm4, %v745_v17  ;;  %v742_v19 = vmul.f32 %v3175_v18, %v3167_v58 }
 0x3a8   :  { %2960 = vmatprep.mubr.msk.bf16.mxu1 %vm3209_vm0, %v3208_v0  ;;  %2959 = vmatpush3.bf16.msra.mxu1 %v3137_v22 }
 0x3a9   :  { %v746_v20 = vpack.c.bf16 %v742_v19, %v742_v19  ;;  %2970 = vmatprep.subr.bf16.mxu1 %v3208_v0  ;;  %v2647_v19 = vld [vmem:[%s3746_s9 + $0x3] ss:$0 sm:$0xff] }
 0x3ab   :  { %2955 = vmatmul.mubr.msk.bf16.vlgmr.msra.gmra.mxu0 %vm698_vm4, %v746_v20 }
 0x3ac   :  { %2966 = vmatprep.mubr.msk.bf16.mxu0 %vm3209_vm0, %v3208_v0  ;;  %2965 = vmatpush3.bf16.msra.mxu0 %v3136_v21 }
 0x3ad   :  { %2978 = vmatprep.subr.bf16.mxu0 %v3208_v0 }
 0x457   :  { %v788_v23 = vpop.f32.mrf.mxu1 }
 0x459   :  { %v2938_v24 = vpop.f32.mrf.mxu1 }
 0x45a   :  { %v3140_v24 = vld [vmem:[%s3748_s8 + $0x8] sm:$0xff]  }
 0x45b   :  { %v791_v25 = vpop.f32.mrf.mxu1  ;;  %v834_v26 = vpop.f32.mrf.mxu0 }
 0x45c   :  { %v932_v27 = vpack.c.bf16 %v834_v26, %v788_v23  ;;  %v3141_v25 = vld [vmem:[%s3748_s8] sm:$0xff]  }
 0x45d   :  { %v2939_v28 = vpop.f32.mrf.mxu1  ;;  %v2944_v29 = vpop.f32.mrf.mxu0  ;;  %v2648_v26 = vld [vmem:[%s3749_s7] ss:$0 sm:$0xff] }
 0x45e   :  { %2967 = vmatmul.mubr.msk.bf16.vlgmr.msra.gmra.mxu0 %vm55_vm1, %v932_v27 }
 0x45f   :  { %v837_v30 = vpop.f32.mrf.mxu0  ;;  %2982 = vmatprep.mubr.msk.bf16.mxu0 %vm3209_vm0, %v3208_v0  ;;  %2979 = vmatpush3.bf16.msra.mxu0 %v3140_v24 }
 0x460   :  { %2980 = vmatprep.subr.bf16.mxu0 %v3208_v0 }
 0x461   :  { %v2945_v31 = vpop.f32.mrf.mxu0 }
 0x463   :  { %2981 = vmatpush3.bf16.msra.mxu0 %v3141_v25 }
 0x464   :  { %2994 = vmatprep.subr.bf16.mxu0 %v3208_v0 }
 0x467   :  { %v880_v32 = vpop.f32.mrf.mxu1 }
 0x469   :  { %v2950_v33 = vpop.f32.mrf.mxu1 }
 0x46b   :  { %v883_v34 = vpop.f32.mrf.mxu1  ;;  %v926_v35 = vpop.f32.mrf.mxu0 }
 0x46c   :  { %v935_v36 = vpack.c.bf16 %v926_v35, %v880_v32 }
 0x46d   :  { %v2951_v37 = vpop.f32.mrf.mxu1  ;;  %v2956_v38 = vpop.f32.mrf.mxu0 }
 0x46e   :  { %2961 = vmatmul.mubr.msk.bf16.vlgmr.msra.gmra.mxu1 %vm55_vm1, %v935_v36  ;;  %v2653_v36 = vld [vmem:[%s3746_s9 + $0x1] ss:$0 sm:$0xff] }
 0x46f   :  { %v929_v39 = vpop.f32.mrf.mxu0  ;;  %2974 = vmatprep.mubr.msk.bf16.mxu1 %vm3209_vm0, %v3208_v0 }
 0x471   :  { %v2957_v40 = vpop.f32.mrf.mxu0 }
 0x51e   :  { %v1032_v41 = vpop.f32.mrf.mxu0 }
 0x520   :  { %v2968_v42 = vpop.f32.mrf.mxu0 }
 0x522   :  { %v1035_v43 = vpop.f32.mrf.mxu0 }
 0x524   :  { %v2969_v44 = vpop.f32.mrf.mxu0 }
 0x52e   :  { %v982_v45 = vpop.f32.mrf.mxu1 }
 0x52f   :  { %v1033_v47 = vadd.f32 %v1032_v41, %v982_v45 }
 0x530   :  { %v2962_v48 = vpop.f32.mrf.mxu1 }
 0x531   :  { %v1046_v49 = vadd.f32 %v2643_v46, %v1033_v47 }
 0x532   :  { %v985_v50 = vpop.f32.mrf.mxu1 }
 0x533   :  { %v1036_v51 = vadd.f32 %v1035_v43, %v985_v50  ;;  %v1048_v52 = vadd.f32 %v1046_v49, %v3313_v13 }
 0x534   :  { %v2963_v53 = vpop.f32.mrf.mxu1 }
 0x535   :  { %v1047_v54 = vadd.f32 %v2643_v46, %v1036_v51  ;;  %v1054_v56 = vsel %vm127_vm2, %v1048_v52, 0.0 }
 0x536   :  { %1055 = vadd.xlane.f32.xlu0 %v1054_v56 }
 0x537   :  { %v1049_v57 = vadd.f32 %v1047_v54, %v3315_v14  ;;  %v3138_v14 = vld [vmem:[%s3747_s6 + $0x8] sm:$0xff]  }
 0x538   :  { %2971 = vmatpush3.bf16.msra.mxu1 %v3138_v14 }
 0x539   :  { %v1057_v58 = vsel %vm127_vm2, %v1049_v57, 0.0  ;;  %2972 = vmatprep.subr.bf16.mxu1 %v3208_v0 }
 0x53a   :  { %1058 = vadd.xlane.f32.xlu1 %v1057_v58  ;;  %v3142_v58 = vld [vmem:[%s3742_s3 + $0x68] sm:$0xff]  }
 0x53c   :  { %2973 = vmatpush3.bf16.msra.mxu1 %v3139_v6  ;;  %v2659_v6 = vld [vmem:[%s3746_s9 + $0x4] ss:$0 sm:$0xff] }
 0x53d   :  { %2986 = vmatprep.subr.bf16.mxu1 %v3208_v0 }
 0x5bf   :  { %v1056_v59 = vpop.xlane.xlu0 %1055 }
 0x5c0   :  { %v1061_v60 = vmul.f32 0.03125, %v1056_v59  ;;  %v3143_v59 = vld [vmem:[%s3742_s3 + $0x88] sm:$0xff]  }
 0x5c2   :  { %v1063_v61 = vsub.f32 %v1048_v52, %v1061_v60  ;;  %v3144_v60 = vld [vmem:[%s3742_s3 + $0x60] sm:$0xff]  }
 0x5c3   :  { %v1059_v62 = vpop.xlane.xlu1 %1058 }
 0x5c4   :  { %v1062_v1 = vmul.f32 0.03125, %v1059_v62  ;;  %v1065_v2 = vmul.f32 %v1063_v61, %v1063_v61 }
 0x5c6   :  { %v1064_v3 = vsub.f32 %v1049_v57, %v1062_v1  ;;  %v1067_v4 = vsel %vm127_vm2, %v1065_v2, 0.0 }
 0x5c7   :  { %1068 = vadd.xlane.f32.xlu0 %v1067_v4 }
 0x5c8   :  { %v1066_v13 = vmul.f32 %v1064_v3, %v1064_v3 }
 0x5ca   :  { %v1070_v5 = vsel %vm127_vm2, %v1066_v13, 0.0 }
 0x5cb   :  { %1071 = vadd.xlane.f32.xlu1 %v1070_v5 }
 0x650   :  { %v1069_v7 = vpop.xlane.xlu0 %1068 }
 0x651   :  { %v1073_v8 = vmul.f32 0.03125, %v1069_v7 }
 0x653   :  { %v1075_v9 = vadd.f32 1e-05, %v1073_v8 }
 0x654   :  { %v1072_v10 = vpop.xlane.xlu1 %1071 }
 0x655   :  { %3176 = vrsqrt.f32 %v1075_v9  ;;  %v1074_v11 = vmul.f32 0.03125, %v1072_v10  ;;  %v2660_v10 = vld [vmem:[%s3746_s9 + $0x5] ss:$0 sm:$0xff] }
 0x657   :  { %v1076_v12 = vadd.f32 1e-05, %v1074_v11 }
 0x659   :  { %3178 = vrsqrt.f32 %v1076_v12 }
 0x662   :  { %v3177_v55 = vpop.eup %3176 }
 0x663   :  { %v1079_v63 = vmul.f32 %v3177_v55, %v1063_v61  ;;  %v3145_v61 = vld [vmem:[%s3742_s3 + $0x80] sm:$0xff]  }
 0x665   :  { %v1087_v18 = vmul.f32 %v2646_v15, %v1079_v63  ;;  %v3146_v63 = vld [vmem:[%s3742_s3 + $0xa8] sm:$0xff]  }
 0x666   :  { %v3179_v16 = vpop.eup %3178 }
 0x667   :  { %v1080_v17 = vmul.f32 %v3179_v16, %v1064_v3  ;;  %v1095_v21 = vadd.f32 %v2647_v19, %v1087_v18  ;;  %v3149_v18 = vld [vmem:[%s3742_s3 + $0x70] sm:$0xff]  }
 0x669   :  { %v1088_v20 = vmul.f32 %v2646_v15, %v1080_v17  ;;  %v3147_v15 = vld [vmem:[%s3742_s3 + $0x78] sm:$0xff]   ;;  %v3148_v17 = vld [vmem:[%s3742_s3 + $0xa0] sm:$0xff]  }
 0x66b   :  { %v1096_v22 = vadd.f32 %v2647_v19, %v1088_v20  ;;  %v3150_v19 = vld [vmem:[%s3742_s3 + $0x98] sm:$0xff]  }
 0x66c   :  { %v3151_v20 = vld [vmem:[%s3742_s3 + $0xb8] sm:$0xff]  }
 0x66d   :  { %v1097_v23 = vpack.c.bf16 %v1096_v22, %v1095_v21 }
 0x66f   :  { %2975 = vmatmul.mubr.msk.bf16.vlgmr.msra.gmra.mxu1 %vm127_vm2, %v1097_v23  ;;  %v2675_v23 = vld [vmem:[%s3744_s4 + $0x8] ss:$0 sm:$0xff] }
 0x670   :  { %2990 = vmatprep.mubr.msk.bf16.mxu1 %vm3209_vm0, %v3208_v0  ;;  %2987 = vmatpush3.bf16.msra.mxu1 %v3142_v58 }
 0x671   :  { %2988 = vmatprep.subr.bf16.mxu1 %v3208_v0 }
 0x674   :  { %2989 = vmatpush3.bf16.msra.mxu1 %v3144_v60  ;;  %v2693_v60 = vld [vmem:[%s3744_s4 + $0x7] ss:$0 sm:$0xff] }
 0x675   :  { %3002 = vmatprep.subr.bf16.mxu1 %v3208_v0 }
 0x72f   :  { %v1158_v27 = vpop.f32.mrf.mxu1 }
 0x730   :  { %v1159_v29 = vadd.f32 %v2648_v26, %v1158_v27 }
 0x731   :  { %v2976_v28 = vpop.f32.mrf.mxu1 }
 0x732   :  { %v1165_v33 = vmax.f32 %v1159_v29, 0.0 }
 0x733   :  { %v1161_v30 = vpop.f32.mrf.mxu1 }
 0x734   :  { %v1162_v31 = vadd.f32 %v2648_v26, %v1161_v30  ;;  %v2666_v30 = vld [vmem:[%s3744_s4 + $0x6] ss:$0 sm:$0xff] }
 0x735   :  { %v2977_v32 = vpop.f32.mrf.mxu1 }
 0x736   :  { %v1166_v34 = vmax.f32 %v1162_v31, 0.0 }
 0x738   :  { %v1167_v35 = vpack.c.bf16 %v1166_v34, %v1165_v33 }
 0x73a   :  { %2983 = vmatmul.mubr.msk.bf16.vlgmr.msra.gmra.mxu0 %vm127_vm2, %v1167_v35 }
 0x73b   :  { %2998 = vmatprep.mubr.msk.bf16.mxu0 %vm3209_vm0, %v3208_v0  ;;  %2995 = vmatpush3.bf16.msra.mxu0 %v3143_v59 }
 0x73c   :  { %2996 = vmatprep.subr.bf16.mxu0 %v3208_v0 }
 0x73f   :  { %2997 = vmatpush3.bf16.msra.mxu0 %v3145_v61 }
 0x740   :  { %3010 = vmatprep.subr.bf16.mxu0 %v3208_v0 }
 0x7fa   :  { %v1229_v37 = vpop.f32.mrf.mxu0 }
 0x7fb   :  { %v1230_v38 = vadd.f32 %v2653_v36, %v1229_v37 }
 0x7fc   :  { %v2984_v39 = vpop.f32.mrf.mxu0 }
 0x7fd   :  { %v1236_v40 = vadd.f32 %v1230_v38, %v1095_v21  ;;  %v3152_v21 = vld [vmem:[%s3742_s3 + $0x90] sm:$0xff]  }
 0x7fe   :  { %v1232_v41 = vpop.f32.mrf.mxu0 }
 0x7ff   :  { %v1233_v42 = vadd.f32 %v2653_v36, %v1232_v41  ;;  %v1242_v43 = vsel %vm127_vm2, %v1236_v40, 0.0 }
 0x800   :  { %1243 = vadd.xlane.f32.xlu0 %v1242_v43  ;;  %v2985_v44 = vpop.f32.mrf.mxu0 }
 0x801   :  { %v1237_v45 = vadd.f32 %v1233_v42, %v1096_v22  ;;  %v3153_v22 = vld [vmem:[%s3742_s3 + $0xb0] sm:$0xff]  }
 0x803   :  { %v1245_v46 = vsel %vm127_vm2, %v1237_v45, 0.0 }
 0x804   :  { %1246 = vadd.xlane.f32.xlu1 %v1245_v46 }
 0x889   :  { %v1244_v47 = vpop.xlane.xlu0 %1243 }
 0x88a   :  { %v1248_v48 = vmul.f32 0.03125, %v1244_v47 }
 0x88c   :  { %v1250_v49 = vsub.f32 %v1236_v40, %v1248_v48 }
 0x88d   :  { %v1247_v50 = vpop.xlane.xlu1 %1246 }
 0x88e   :  { %v1249_v51 = vmul.f32 0.03125, %v1247_v50  ;;  %v1252_v52 = vmul.f32 %v1250_v49, %v1250_v49  ;;  %v2702_v50 = vld [vmem:[%s3744_s4 + $0x9] ss:$0 sm:$0xff] }
 0x890   :  { %v1251_v53 = vsub.f32 %v1237_v45, %v1249_v51  ;;  %v1254_v54 = vsel %vm127_vm2, %v1252_v52, 0.0 }
 0x891   :  { %1255 = vadd.xlane.f32.xlu0 %v1254_v54 }
 0x892   :  { %v1253_v56 = vmul.f32 %v1251_v53, %v1251_v53 }
 0x894   :  { %v1257_v57 = vsel %vm127_vm2, %v1253_v56, 0.0  ;;  %v2684_v56 = vld [vmem:[%s3744_s4 + $0xa] ss:$0 sm:$0xff] }
 0x895   :  { %1258 = vadd.xlane.f32.xlu1 %v1257_v57 }
 0x91a   :  { %v1256_v62 = vpop.xlane.xlu0 %1255 }
 0x91b   :  { %v1260_v1 = vmul.f32 0.03125, %v1256_v62 }
 0x91d   :  { %v1262_v2 = vadd.f32 1e-05, %v1260_v1 }
 0x91e   :  { %v1259_v3 = vpop.xlane.xlu1 %1258 }
 0x91f   :  { %3180 = vrsqrt.f32 %v1262_v2  ;;  %v1261_v4 = vmul.f32 0.03125, %v1259_v3 }
 0x921   :  { %v1263_v13 = vadd.f32 1e-05, %v1261_v4 }
 0x923   :  { %3182 = vrsqrt.f32 %v1263_v13 }
 0x92c   :  { %v3181_v5 = vpop.eup %3180 }
 0x92d   :  { %v1266_v14 = vmul.f32 %v3181_v5, %v1250_v49 }
 0x92f   :  { %v1274_v8 = vmul.f32 %v2659_v6, %v1266_v14 }
 0x930   :  { %v3183_v7 = vpop.eup %3182 }
 0x931   :  { %v1267_v9 = vmul.f32 %v3183_v7, %v1251_v53  ;;  %v3524_v12 = vadd.f32 %v2660_v10, %v1274_v8 }
 0x933   :  { %v1275_v11 = vmul.f32 %v2659_v6, %v1267_v9 }
 0x935   :  { %v3526_v55 = vadd.f32 %v2660_v10, %v1275_v11 }
 0x937   :  { %v1284_v16 = vpack.c.bf16 %v3526_v55, %v3524_v12 }
 0x939   :  { %2991 = vmatmul.mubr.msk.bf16.vlgmr.msra.gmra.mxu1 %vm127_vm2, %v1284_v16  ;;  %2999 = vmatmul.mubr.msk.bf16.vlgmr.msra.gmra.mxu0 %vm127_vm2, %v1284_v16 }
 0x93a   :  { %3003 = vmatpush3.bf16.msra.mxu1 %v3146_v63  ;;  %3011 = vmatpush3.bf16.msra.mxu0 %v3147_v15 }
 0x93b   :  { %3004 = vmatprep.subr.bf16.mxu1 %v3208_v0  ;;  %3012 = vmatprep.subr.bf16.mxu0 %v3208_v0 }
 0x93c   :  { %3006 = vmatprep.mubr.msk.bf16.mxu1 %vm3209_vm0, %v3208_v0  ;;  %3014 = vmatprep.mubr.msk.bf16.mxu0 %vm3209_vm0, %v3208_v0 }
 0x93e   :  { %3005 = vmatpush3.bf16.msra.mxu1 %v3148_v17  ;;  %3013 = vmatpush3.bf16.msra.mxu0 %v3149_v18 }
 0x93f   :  { %3018 = vmatprep.subr.bf16.mxu1 %v3208_v0  ;;  %3026 = vmatprep.subr.bf16.mxu0 %v3208_v0 }
 0x941   :  { %3007 = vmatmul.mubr.msk.bf16.vlgmr.msra.gmra.mxu1 %vm127_vm2, %v1284_v16  ;;  %3015 = vmatmul.mubr.msk.bf16.vlgmr.msra.gmra.mxu0 %vm127_vm2, %v1284_v16 }
 0x942   :  { %3019 = vmatpush3.bf16.msra.mxu1 %v3150_v19  ;;  %3027 = vmatpush3.bf16.msra.mxu0 %v3151_v20 }
 0x943   :  { %3020 = vmatprep.subr.bf16.mxu1 %v3208_v0  ;;  %3028 = vmatprep.subr.bf16.mxu0 %v3208_v0 }
 0x944   :  { %3022 = vmatprep.mubr.msk.bf16.mxu1 %vm3209_vm0, %v3208_v0  ;;  %3030 = vmatprep.mubr.msk.bf16.mxu0 %vm3209_vm0, %v3208_v0 }
 0x946   :  { %3021 = vmatpush3.bf16.msra.mxu1 %v3152_v21  ;;  %3029 = vmatpush3.bf16.msra.mxu0 %v3153_v22 }
 0x947   :  { %3034 = vmatprep.subr.bf16.mxu1 %v3208_v0  ;;  %3040 = vmatprep.subr.bf16.mxu0 %v3208_v0 }
 0x949   :  { %3023 = vmatmul.mubr.msk.bf16.vlgmr.msra.gmra.mxu1 %vm127_vm2, %v1284_v16  ;;  %3031 = vmatmul.mubr.msk.bf16.vlgmr.msra.gmra.mxu0 %vm127_vm2, %v1284_v16 }
 0x94a   :  { %3036 = vmatprep.mubr.msk.bf16.mxu1 %vm3209_vm0, %v3208_v0  ;;  %3042 = vmatprep.mubr.msk.bf16.mxu0 %vm3209_vm0, %v3208_v0 }
 0x9f9   :  { %v1347_v24 = vpop.f32.mrf.mxu1  ;;  %v1413_v25 = vpop.f32.mrf.mxu0 }
 0x9fa   :  { %v1414_v26 = vadd.f32 %v2675_v23, %v1413_v25  ;;  %v1348_v37 = vadd.f32 %v2666_v30, %v1347_v24 }
 0x9fb   :  { %v2992_v27 = vpop.f32.mrf.mxu1  ;;  %v3000_v28 = vpop.f32.mrf.mxu0 }
 0x9fc   :  { %v1688_v29 = vpack.c.bf16 %v1414_v26, %v1414_v26  ;;  %v1684_v44 = vpack.c.bf16 %v1348_v37, %v1348_v37 }
 0x9fd   :  { %v1350_v31 = vpop.f32.mrf.mxu1  ;;  %v1416_v32 = vpop.f32.mrf.mxu0 }
 0x9fe   :  { %v1700_v33 = vsel %vm55_vm1, %v1688_v29, 0  ;;  %v1417_v34 = vadd.f32 %v2675_v23, %v1416_v32  ;;  %v1351_v45 = vadd.f32 %v2666_v30, %v1350_v31 }
 0x9ff   :  { %v2993_v35 = vpop.f32.mrf.mxu1  ;;  %v3001_v36 = vpop.f32.mrf.mxu0  ;;  %3035 = vmatpush3.bf16.xpose.msra.mxu1 %v1700_v33 }
 0xa00   :  { %v1689_v38 = vpack.c.bf16 %v1417_v34, %v1417_v34  ;;  %3046 = vmatprep.subr.bf16.mxu1 %v3208_v0  ;;  %v1685_v51 = vpack.c.bf16 %v1351_v45, %v1351_v45 }
 0xa01   :  { %v1479_v39 = vpop.f32.mrf.mxu1  ;;  %v1545_v40 = vpop.f32.mrf.mxu0 }
 0xa02   :  { %v1746_v41 = vsel %vm55_vm1, %v1689_v38, 0  ;;  %v1480_v1 = vadd.f32 %v2684_v56, %v1479_v39  ;;  %v1546_v5 = vadd.f32 %v2693_v60, %v1545_v40 }
 0xa03   :  { %v3008_v42 = vpop.f32.mrf.mxu1  ;;  %v3016_v43 = vpop.f32.mrf.mxu0  ;;  %3041 = vmatpush3.bf16.xpose.msra.mxu0 %v1746_v41 }
 0xa04   :  { %3052 = vmatprep.subr.bf16.mxu0 %v3208_v0  ;;  %v1692_v6 = vpack.c.bf16 %v1480_v1, %v1480_v1  ;;  %v1686_v9 = vpack.c.bf16 %v1546_v5, %v1546_v5 }
 0xa05   :  { %v1482_v46 = vpop.f32.mrf.mxu1  ;;  %v1548_v47 = vpop.f32.mrf.mxu0 }
 0xa06   :  { %3037 = vmatmul.mubr.msk.bf16.vlgmr.msra.gmra.mxu1 %vm55_vm1, %v1684_v44  ;;  %v1483_v7 = vadd.f32 %v2684_v56, %v1482_v46  ;;  %v1549_v10 = vadd.f32 %v2693_v60, %v1548_v47  ;;  %v1932_v11 = vsel %vm750_vm3, %v1692_v6, 0 }
 0xa07   :  { %v3009_v48 = vpop.f32.mrf.mxu1  ;;  %v3017_v49 = vpop.f32.mrf.mxu0  ;;  %3048 = vmatprep.mubr.msk.bf16.mxu1 %vm3209_vm0, %v3208_v0 }
 0xa08   :  { %v1693_v63 = vpack.c.bf16 %v1483_v7, %v1483_v7  ;;  %v1687_v15 = vpack.c.bf16 %v1549_v10, %v1549_v10 }
 0xa09   :  { %v1611_v52 = vpop.f32.mrf.mxu1  ;;  %v3596_v53 = vpop.f32.mrf.mxu0 }
 0xa0a   :  { %v1612_v54 = vadd.f32 %v2702_v50, %v1611_v52  ;;  %3043 = vmatmul.mubr.msk.bf16.vlgmr.msra.gmra.mxu0 %vm55_vm1, %v1685_v51  ;;  %v1978_v16 = vsel %vm750_vm3, %v1693_v63, 0 }
 0xa0b   :  { %v3024_v57 = vpop.f32.mrf.mxu1  ;;  %v3032_v58 = vpop.f32.mrf.mxu0  ;;  %3054 = vmatprep.mubr.msk.bf16.mxu0 %vm3209_vm0, %v3208_v0 }
 0xa0c   :  { %v1690_v59 = vpack.c.bf16 %v1612_v54, %v1612_v54 }
 0xa0d   :  { %v1614_v61 = vpop.f32.mrf.mxu1  ;;  %v3607_v62 = vpop.f32.mrf.mxu0 }
 0xa0e   :  { %v1792_v2 = vsel %vm55_vm1, %v1690_v59, 0  ;;  %v1615_v3 = vadd.f32 %v2702_v50, %v1614_v61  ;;  %v2711_v61 = vld [vmem:[%s3744_s4 + $0xb] ss:$0 sm:$0xff] }
 0xa0f   :  { %v3025_v4 = vpop.f32.mrf.mxu1  ;;  %v3033_v13 = vpop.f32.mrf.mxu0  ;;  %3047 = vmatpush3.bf16.xpose.msra.mxu1 %v1792_v2  ;;  %v1678_v1 = vadd.f32 %v2711_v61, %v3596_v53 }
 0xa10   :  { %v1691_v14 = vpack.c.bf16 %v1615_v3, %v1615_v3  ;;  %3058 = vmatprep.subr.bf16.mxu1 %v3208_v0  ;;  %v1681_v4 = vadd.f32 %v2711_v61, %v3607_v62 }
 0xa11   :  { %v1694_v3 = vpack.c.bf16 %v1678_v1, %v1678_v1 }
 0xa12   :  { %v1838_v8 = vsel %vm55_vm1, %v1691_v14, 0 }
 0xa13   :  { %3053 = vmatpush3.bf16.xpose.msra.mxu0 %v1838_v8  ;;  %v2024_v7 = vsel %vm750_vm3, %v1694_v3, 0  ;;  %v1695_v8 = vpack.c.bf16 %v1681_v4, %v1681_v4 }
 0xa14   :  { %3064 = vmatprep.subr.bf16.mxu0 %v3208_v0 }
 0xa15   :  { %v2070_v62 = vsel %vm750_vm3, %v1695_v8, 0 }
 0xa16   :  { %3049 = vmatmul.mubr.msk.bf16.vlgmr.msra.gmra.mxu1 %vm55_vm1, %v1686_v9 }
 0xa17   :  { %3059 = vmatpush3.bf16.msra.mxu1 %v1932_v11  ;;  %3060 = vmatprep.mubr.msk.bf16.mxu1 %vm3209_vm0, %v3208_v0 }
 0xa18   :  { %3070 = vmatprep.subr.bf16.mxu1 %v3208_v0 }
 0xa1a   :  { %3055 = vmatmul.mubr.msk.bf16.vlgmr.msra.gmra.mxu0 %vm55_vm1, %v1687_v15 }
 0xa1b   :  { %3065 = vmatpush3.bf16.msra.mxu0 %v1978_v16  ;;  %3066 = vmatprep.mubr.msk.bf16.mxu0 %vm3209_vm0, %v3208_v0 }
 0xa1c   :  { %3076 = vmatprep.subr.bf16.mxu0 %v3208_v0 }
 0xac6   :  { %v1736_v17 = vpop.f32.mrf.mxu1 }
 0xac7   :  { %v1880_v18 = vsel %vm698_vm4, %v1736_v17, -inf }
 0xac8   :  { %1881 = vmax.xlane.f32.xlu0 %v1880_v18  ;;  %v3038_v19 = vpop.f32.mrf.mxu1 }
 0xac9   :  { %v3154_v19 = vld [vmem:[%s3745_s5 + $0x10] sm:$0xff]  }
 0xaca   :  { %v1739_v20 = vpop.f32.mrf.mxu1  ;;  %v1782_v21 = vpop.f32.mrf.mxu0 }
 0xacb   :  { %v1883_v22 = vsel %vm698_vm4, %v1782_v21, -inf  ;;  %v3155_v20 = vld [vmem:[%s3745_s5 + $0x18] sm:$0xff]  }
 0xacc   :  { %v3039_v23 = vpop.f32.mrf.mxu1  ;;  %1884 = vmax.xlane.f32.xlu1 %v1883_v22  ;;  %v3044_v24 = vpop.f32.mrf.mxu0 }
 0xace   :  { %v1785_v25 = vpop.f32.mrf.mxu0 }
 0xad0   :  { %v3045_v26 = vpop.f32.mrf.mxu0 }
 0xad6   :  { %v1828_v27 = vpop.f32.mrf.mxu1 }
 0xad7   :  { %v1886_v28 = vsel %vm698_vm4, %v1828_v27, -inf }
 0xad8   :  { %1887 = vmax.xlane.f32.xlu0 %v1886_v28  ;;  %v3050_v29 = vpop.f32.mrf.mxu1 }
 0xada   :  { %v1831_v30 = vpop.f32.mrf.mxu1  ;;  %v1874_v31 = vpop.f32.mrf.mxu0 }
 0xadb   :  { %v1889_v32 = vsel %vm698_vm4, %v1874_v31, -inf }
 0xadc   :  { %v3051_v33 = vpop.f32.mrf.mxu1  ;;  %1890 = vmax.xlane.f32.xlu1 %v1889_v32  ;;  %v3056_v34 = vpop.f32.mrf.mxu0 }
 0xade   :  { %v1877_v35 = vpop.f32.mrf.mxu0 }
 0xae0   :  { %v3057_v36 = vpop.f32.mrf.mxu0 }
 0xb51   :  { %v1882_v37 = vpop.xlane.xlu0 %1881 }
 0xb52   :  { %v1892_v38 = vsub.f32 %v1736_v17, %v1882_v37 }
 0xb54   :  { %v1896_v39 = vmul.f32 1.442695, %v1892_v38 }
 0xb55   :  { %v1885_v40 = vpop.xlane.xlu1 %1884 }
 0xb56   :  { %3184 = vpow2.f32 %v1896_v39  ;;  %v1893_v41 = vsub.f32 %v1782_v21, %v1885_v40 }
 0xb58   :  { %v1898_v42 = vmul.f32 1.442695, %v1893_v41 }
 0xb5a   :  { %3186 = vpow2.f32 %v1898_v42 }
 0xb61   :  { %v1888_v43 = vpop.xlane.xlu0 %1887 }
 0xb62   :  { %v1894_v44 = vsub.f32 %v1828_v27, %v1888_v43 }
 0xb63   :  { %v3185_v45 = vpop.eup %3184 }
 0xb64   :  { %v1900_v46 = vmul.f32 1.442695, %v1894_v44  ;;  %v1904_v47 = vsel %vm698_vm4, %v3185_v45, 0.0  ;;  %v2732_v44 = vld [vmem:[%s3746_s9 + $0x6] ss:$0 sm:$0xff] }
 0xb65   :  { %1905 = vadd.xlane.f32.xlu0 %v1904_v47  ;;  %v1891_v48 = vpop.xlane.xlu1 %1890 }
 0xb66   :  { %3188 = vpow2.f32 %v1900_v46  ;;  %v1895_v49 = vsub.f32 %v1874_v31, %v1891_v48 }
 0xb67   :  { %v3187_v50 = vpop.eup %3186 }
 0xb68   :  { %v1902_v51 = vmul.f32 1.442695, %v1895_v49  ;;  %v1907_v52 = vsel %vm698_vm4, %v3187_v50, 0.0 }
 0xb69   :  { %1908 = vadd.xlane.f32.xlu1 %v1907_v52 }
 0xb6a   :  { %3190 = vpow2.f32 %v1902_v51 }
 0xb73   :  { %v3189_v54 = vpop.eup %3188 }
 0xb74   :  { %v1910_v56 = vsel %vm698_vm4, %v3189_v54, 0.0 }
 0xb75   :  { %1911 = vadd.xlane.f32.xlu0 %v1910_v56 }
 0xb77   :  { %v3191_v57 = vpop.eup %3190 }
 0xb78   :  { %v1913_v58 = vsel %vm698_vm4, %v3191_v57, 0.0 }
 0xb79   :  { %1914 = vadd.xlane.f32.xlu1 %v1913_v58 }
 0xbee   :  { %v1906_v59 = vpop.xlane.xlu0 %1905 }
 0xbef   :  { %3192 = vrcp.f32 %v1906_v59 }
 0xbf2   :  { %v1909_v60 = vpop.xlane.xlu1 %1908 }
 0xbf3   :  { %3194 = vrcp.f32 %v1909_v60 }
 0xbfc   :  { %v3193_v2 = vpop.eup %3192 }
 0xbfd   :  { %v1920_v13 = vmul.f32 %v3193_v2, %v3185_v45 }
 0xbfe   :  { %v1912_v5 = vpop.xlane.xlu0 %1911 }
 0xbff   :  { %3196 = vrcp.f32 %v1912_v5  ;;  %v1924_v14 = vpack.c.bf16 %v1920_v13, %v1920_v13  ;;  %v3157_v5 = vld [vmem:[%s3747_s6 + $0x10] sm:$0xff]  }
 0xc00   :  { %v3195_v6 = vpop.eup %3194 }
 0xc01   :  { %3061 = vmatmul.mubr.msk.bf16.vlgmr.msra.gmra.mxu1 %vm698_vm4, %v1924_v14  ;;  %v1921_v9 = vmul.f32 %v3195_v6, %v3187_v50 }
 0xc02   :  { %3071 = vmatpush3.bf16.msra.mxu1 %v2024_v7  ;;  %v1915_v10 = vpop.xlane.xlu1 %1914  ;;  %3072 = vmatprep.mubr.msk.bf16.mxu1 %vm3209_vm0, %v3208_v0 }
 0xc03   :  { %3198 = vrcp.f32 %v1915_v10  ;;  %v1925_v53 = vpack.c.bf16 %v1921_v9, %v1921_v9  ;;  %3082 = vmatprep.subr.bf16.mxu1 %v3208_v0 }
 0xc05   :  { %3067 = vmatmul.mubr.msk.bf16.vlgmr.msra.gmra.mxu0 %vm698_vm4, %v1925_v53 }
 0xc06   :  { %3077 = vmatpush3.bf16.msra.mxu0 %v2070_v62  ;;  %3078 = vmatprep.mubr.msk.bf16.mxu0 %vm3209_vm0, %v3208_v0 }
 0xc07   :  { %3088 = vmatprep.subr.bf16.mxu0 %v3208_v0 }
 0xc0c   :  { %v3197_v11 = vpop.eup %3196 }
 0xc0d   :  { %v1922_v63 = vmul.f32 %v3197_v11, %v3189_v54  ;;  %v2735_v11 = vld [vmem:[%s3746_s9 + $0x8] ss:$0 sm:$0xff] }
 0xc0f   :  { %v1926_v15 = vpack.c.bf16 %v1922_v63, %v1922_v63 }
 0xc10   :  { %v3199_v16 = vpop.eup %3198 }
 0xc11   :  { %3073 = vmatmul.mubr.msk.bf16.vlgmr.msra.gmra.mxu1 %vm698_vm4, %v1926_v15  ;;  %v1923_v17 = vmul.f32 %v3199_v16, %v3191_v57 }
 0xc12   :  { %3084 = vmatprep.mubr.msk.bf16.mxu1 %vm3209_vm0, %v3208_v0  ;;  %3083 = vmatpush3.bf16.msra.mxu1 %v3155_v20 }
 0xc13   :  { %v1927_v18 = vpack.c.bf16 %v1923_v17, %v1923_v17  ;;  %3094 = vmatprep.subr.bf16.mxu1 %v3208_v0  ;;  %v2736_v17 = vld [vmem:[%s3746_s9 + $0x9] ss:$0 sm:$0xff] }
 0xc15   :  { %3079 = vmatmul.mubr.msk.bf16.vlgmr.msra.gmra.mxu0 %vm698_vm4, %v1927_v18 }
 0xc16   :  { %3090 = vmatprep.mubr.msk.bf16.mxu0 %vm3209_vm0, %v3208_v0  ;;  %3089 = vmatpush3.bf16.msra.mxu0 %v3154_v19 }
 0xc17   :  { %3102 = vmatprep.subr.bf16.mxu0 %v3208_v0 }
 0xcc1   :  { %v1968_v21 = vpop.f32.mrf.mxu1 }
 0xcc3   :  { %v3062_v22 = vpop.f32.mrf.mxu1 }
 0xcc4   :  { %v3158_v22 = vld [vmem:[%s3748_s8 + $0x18] sm:$0xff]  }
 0xcc5   :  { %v1971_v23 = vpop.f32.mrf.mxu1  ;;  %v2014_v24 = vpop.f32.mrf.mxu0 }
 0xcc6   :  { %v2112_v25 = vpack.c.bf16 %v2014_v24, %v1968_v21  ;;  %v3159_v23 = vld [vmem:[%s3748_s8 + $0x10] sm:$0xff]   ;;  %v2742_v24 = vld [vmem:[%s3749_s7 + $0x1] ss:$0 sm:$0xff] }
 0xcc7   :  { %v3063_v26 = vpop.f32.mrf.mxu1  ;;  %v3068_v27 = vpop.f32.mrf.mxu0 }
 0xcc8   :  { %3091 = vmatmul.mubr.msk.bf16.vlgmr.msra.gmra.mxu0 %vm55_vm1, %v2112_v25 }
 0xcc9   :  { %v2017_v28 = vpop.f32.mrf.mxu0  ;;  %3106 = vmatprep.mubr.msk.bf16.mxu0 %vm3209_vm0, %v3208_v0  ;;  %3103 = vmatpush3.bf16.msra.mxu0 %v3158_v22 }
 0xcca   :  { %3104 = vmatprep.subr.bf16.mxu0 %v3208_v0 }
 0xccb   :  { %v3069_v29 = vpop.f32.mrf.mxu0 }
 0xccd   :  { %3105 = vmatpush3.bf16.msra.mxu0 %v3159_v23 }
 0xcd1   :  { %v2060_v30 = vpop.f32.mrf.mxu1 }
 0xcd3   :  { %v3074_v31 = vpop.f32.mrf.mxu1 }
 0xcd5   :  { %v2063_v32 = vpop.f32.mrf.mxu1  ;;  %v2106_v33 = vpop.f32.mrf.mxu0 }
 0xcd6   :  { %v2116_v34 = vpack.c.bf16 %v2106_v33, %v2060_v30 }
 0xcd7   :  { %v3075_v35 = vpop.f32.mrf.mxu1  ;;  %v3080_v36 = vpop.f32.mrf.mxu0 }
 0xcd8   :  { %3085 = vmatmul.mubr.msk.bf16.vlgmr.msra.gmra.mxu1 %vm55_vm1, %v2116_v34  ;;  %v2751_v34 = vld [vmem:[%s3746_s9 + $0x7] ss:$0 sm:$0xff] }
 0xcd9   :  { %v2109_v37 = vpop.f32.mrf.mxu0  ;;  %3098 = vmatprep.mubr.msk.bf16.mxu1 %vm3209_vm0, %v3208_v0 }
 0xcdb   :  { %v3081_v38 = vpop.f32.mrf.mxu0 }
 0xd88   :  { %v2213_v39 = vpop.f32.mrf.mxu0 }
 0xd8a   :  { %v3092_v40 = vpop.f32.mrf.mxu0 }
 0xd8c   :  { %v2216_v41 = vpop.f32.mrf.mxu0 }
 0xd8e   :  { %v3093_v42 = vpop.f32.mrf.mxu0 }
 0xd98   :  { %v2163_v43 = vpop.f32.mrf.mxu1 }
 0xd99   :  { %v2214_v45 = vadd.f32 %v2213_v39, %v2163_v43 }
 0xd9a   :  { %v3086_v46 = vpop.f32.mrf.mxu1 }
 0xd9b   :  { %v2228_v47 = vadd.f32 %v2732_v44, %v2214_v45 }
 0xd9c   :  { %v2166_v48 = vpop.f32.mrf.mxu1 }
 0xd9d   :  { %v2217_v49 = vadd.f32 %v2216_v41, %v2166_v48  ;;  %v2230_v50 = vadd.f32 %v2228_v47, %v3524_v12 }
 0xd9e   :  { %v3087_v51 = vpop.f32.mrf.mxu1 }
 0xd9f   :  { %v2229_v52 = vadd.f32 %v2732_v44, %v2217_v49  ;;  %v2236_v54 = vsel %vm127_vm2, %v2230_v50, 0.0 }
 0xda0   :  { %2237 = vadd.xlane.f32.xlu0 %v2236_v54 }
 0xda1   :  { %v2231_v56 = vadd.f32 %v2229_v52, %v3526_v55  ;;  %v3156_v55 = vld [vmem:[%s3747_s6 + $0x18] sm:$0xff]  }
 0xda2   :  { %3095 = vmatpush3.bf16.msra.mxu1 %v3156_v55 }
 0xda3   :  { %v2239_v57 = vsel %vm127_vm2, %v2231_v56, 0.0  ;;  %3096 = vmatprep.subr.bf16.mxu1 %v3208_v0 }
 0xda4   :  { %2240 = vadd.xlane.f32.xlu1 %v2239_v57  ;;  %v2488_v57 = vld [vmem:[%s3750_s10 + $0x18] sm:$0xff] }
 0xda6   :  { %3097 = vmatpush3.bf16.msra.mxu1 %v3157_v5  ;;  %v2757_v5 = vld [vmem:[%s3746_s9 + $0xa] ss:$0 sm:$0xff] }
 0xda7   :  { %3110 = vmatprep.subr.mxu1 %v3208_v0 }
 0xe29   :  { %v2238_v58 = vpop.xlane.xlu0 %2237 }
 0xe2a   :  { %v2242_v59 = vmul.f32 0.03125, %v2238_v58  ;;  %v2487_v58 = vld [vmem:[%s3750_s10 + $0x10] sm:$0xff] }
 0xe2c   :  { %v2244_v60 = vsub.f32 %v2230_v50, %v2242_v59  ;;  %v2486_v59 = vld [vmem:[%s3750_s10 + $0x8] sm:$0xff] }
 0xe2d   :  { %v2241_v61 = vpop.xlane.xlu1 %2240 }
 0xe2e   :  { %v2243_v1 = vmul.f32 0.03125, %v2241_v61  ;;  %v2246_v2 = vmul.f32 %v2244_v60, %v2244_v60  ;;  %v17_v61 = vstv %s3751_s11 }
 0xe2f   :  { %18 = vst [vmem:[#allocation2] sm:$0x1] %v17_v61 }
 0xe30   :  { %v2245_v3 = vsub.f32 %v2231_v56, %v2243_v1  ;;  %v2248_v4 = vsel %vm127_vm2, %v2246_v2, 0.0 }
 0xe31   :  { %2249 = vadd.xlane.f32.xlu0 %v2248_v4 }
 0xe32   :  { %v2247_v12 = vmul.f32 %v2245_v3, %v2245_v3 }
 0xe34   :  { %v2251_v13 = vsel %vm127_vm2, %v2247_v12, 0.0 }
 0xe35   :  { %2252 = vadd.xlane.f32.xlu1 %v2251_v13 }
 0xeba   :  { %v2250_v14 = vpop.xlane.xlu0 %2249 }
 0xebb   :  { %v2254_v6 = vmul.f32 0.03125, %v2250_v14  ;;  %v2758_v14 = vld [vmem:[%s3746_s9 + $0xb] ss:$0 sm:$0xff] }
 0xebd   :  { %v2256_v7 = vadd.f32 1e-05, %v2254_v6 }
 0xebe   :  { %v2253_v8 = vpop.xlane.xlu1 %2252 }
 0xebf   :  { %3200 = vrsqrt.f32 %v2256_v7  ;;  %v2255_v9 = vmul.f32 0.03125, %v2253_v8 }
 0xec1   :  { %v2257_v10 = vadd.f32 1e-05, %v2255_v9 }
 0xec3   :  { %3202 = vrsqrt.f32 %v2257_v10 }
 0xecc   :  { %v3201_v53 = vpop.eup %3200 }
 0xecd   :  { %v2260_v62 = vmul.f32 %v3201_v53, %v2244_v60  ;;  %v2485_v60 = vld [vmem:[%s3750_s10] sm:$0xff] }
 0xecf   :  { %v2268_v16 = vmul.f32 %v2735_v11, %v2260_v62 }
 0xed0   :  { %v3203_v63 = vpop.eup %3202 }
 0xed1   :  { %v2261_v15 = vmul.f32 %v3203_v63, %v2245_v3  ;;  %v2276_v19 = vadd.f32 %v2736_v17, %v2268_v16 }
 0xed3   :  { %v2269_v18 = vmul.f32 %v2735_v11, %v2261_v15 }
 0xed5   :  { %v2277_v20 = vadd.f32 %v2736_v17, %v2269_v18 }
 0xed7   :  { %v2278_v21 = vpack.c.bf16 %v2277_v20, %v2276_v19 }
 0xed9   :  { %3099 = vmatmul.mubr.msk.bf16.vlgmr.msra.gmra.mxu1 %vm127_vm2, %v2278_v21 }
 0xeda   :  { %3118 = vmatprep.mubr.msk.f32.mxu1 %vm3209_vm0, %v3208_v0  ;;  %3111 = vmatpush3.msra.mxu1 %v2488_v57 }
 0xedb   :  { %3112 = vmatprep.subr.mxu1 %v3208_v0 }
 0xedc   :  { %3113 = vmatpush3.msra.mxu1 %v2487_v58 }
 0xedd   :  { %3114 = vmatprep.subr.mxu1 %v3208_v0 }
 0xede   :  { %3115 = vmatpush3.msra.mxu1 %v2486_v59 }
 0xedf   :  { %3116 = vmatprep.subr.mxu1 %v3208_v0 }
 0xee0   :  { %3117 = vmatpush3.msra.mxu1 %v2485_v60 }
 0xf99   :  { %v2341_v25 = vpop.f32.mrf.mxu1 }
 0xf9a   :  { %v2342_v27 = vadd.f32 %v2742_v24, %v2341_v25 }
 0xf9b   :  { %v3100_v26 = vpop.f32.mrf.mxu1 }
 0xf9c   :  { %v2348_v31 = vmax.f32 %v2342_v27, 0.0 }
 0xf9d   :  { %v2344_v28 = vpop.f32.mrf.mxu1 }
 0xf9e   :  { %v2345_v29 = vadd.f32 %v2742_v24, %v2344_v28 }
 0xf9f   :  { %v3101_v30 = vpop.f32.mrf.mxu1 }
 0xfa0   :  { %v2349_v32 = vmax.f32 %v2345_v29, 0.0  ;;  %v2759_v29 = vld [vmem:[#allocation2] ss:$0 sm:$0xff] }
 0xfa2   :  { %v2350_v33 = vpack.c.bf16 %v2349_v32, %v2348_v31 }
 0xfa4   :  { %3107 = vmatmul.mubr.msk.bf16.vlgmr.msra.gmra.mxu0 %vm127_vm2, %v2350_v33 }
0x1064   :  { %v2413_v35 = vpop.f32.mrf.mxu0 }
0x1065   :  { %v2414_v36 = vadd.f32 %v2751_v34, %v2413_v35 }
0x1066   :  { %v3108_v37 = vpop.f32.mrf.mxu0 }
0x1067   :  { %v2420_v38 = vadd.f32 %v2414_v36, %v2276_v19 }
0x1068   :  { %v2416_v39 = vpop.f32.mrf.mxu0 }
0x1069   :  { %v2417_v40 = vadd.f32 %v2751_v34, %v2416_v39  ;;  %v2426_v41 = vsel %vm127_vm2, %v2420_v38, 0.0 }
0x106a   :  { %2427 = vadd.xlane.f32.xlu0 %v2426_v41  ;;  %v3109_v42 = vpop.f32.mrf.mxu0 }
0x106b   :  { %v2421_v43 = vadd.f32 %v2417_v40, %v2277_v20 }
0x106d   :  { %v2429_v44 = vsel %vm127_vm2, %v2421_v43, 0.0 }
0x106e   :  { %2430 = vadd.xlane.f32.xlu1 %v2429_v44 }
0x10f3   :  { %v2428_v45 = vpop.xlane.xlu0 %2427 }
0x10f4   :  { %v2432_v46 = vmul.f32 0.03125, %v2428_v45 }
0x10f6   :  { %v2434_v47 = vsub.f32 %v2420_v38, %v2432_v46 }
0x10f7   :  { %v2431_v48 = vpop.xlane.xlu1 %2430 }
0x10f8   :  { %v2433_v49 = vmul.f32 0.03125, %v2431_v48  ;;  %v2436_v50 = vmul.f32 %v2434_v47, %v2434_v47 }
0x10fa   :  { %v2435_v51 = vsub.f32 %v2421_v43, %v2433_v49  ;;  %v2438_v52 = vsel %vm127_vm2, %v2436_v50, 0.0 }
0x10fb   :  { %2439 = vadd.xlane.f32.xlu0 %v2438_v52 }
0x10fc   :  { %v2437_v54 = vmul.f32 %v2435_v51, %v2435_v51 }
0x10fe   :  { %v2441_v56 = vsel %vm127_vm2, %v2437_v54, 0.0 }
0x10ff   :  { %2442 = vadd.xlane.f32.xlu1 %v2441_v56 }
0x1184   :  { %v2440_v1 = vpop.xlane.xlu0 %2439 }
0x1185   :  { %v2444_v2 = vmul.f32 0.03125, %v2440_v1 }
0x1187   :  { %v2446_v3 = vadd.f32 1e-05, %v2444_v2 }
0x1188   :  { %v2443_v4 = vpop.xlane.xlu1 %2442 }
0x1189   :  { %3204 = vrsqrt.f32 %v2446_v3  ;;  %v2445_v12 = vmul.f32 0.03125, %v2443_v4 }
0x118b   :  { %v2447_v13 = vadd.f32 1e-05, %v2445_v12 }
0x118d   :  { %3206 = vrsqrt.f32 %v2447_v13 }
0x1196   :  { %v3205_v55 = vpop.eup %3204 }
0x1197   :  { %v2450_v0 = vmul.f32 %v3205_v55, %v2434_v47 }
0x1199   :  { %v2458_v6 = vmul.f32 %v2757_v5, %v2450_v0 }
0x119a   :  { %v3207_v7 = vpop.eup %3206 }
0x119b   :  { %v2451_v8 = vmul.f32 %v3207_v7, %v2435_v51  ;;  %v2466_v9 = vadd.f32 %v2758_v14, %v2458_v6 }
0x119d   :  { %v2459_v10 = vmul.f32 %v2757_v5, %v2451_v8  ;;  %v2468_v53 = vsel %vm127_vm2, %v2466_v9, 0.0 }
0x119e   :  { %v2469_v62 = vrot.slane %v2468_v53, 4 }
0x119f   :  { %v2467_v11 = vadd.f32 %v2758_v14, %v2459_v10 }
0x11a0   :  { %v2470_v63 = vadd.f32 %v2469_v62, %v2468_v53 }
0x11a1   :  { %v2475_v15 = vsel %vm127_vm2, %v2467_v11, 0.0 }
0x11a2   :  { %v2471_v16 = vrot.slane %v2470_v63, 2  ;;  %v2476_v17 = vrot.slane %v2475_v15, 4 }
0x11a4   :  { %v2472_v18 = vadd.f32 %v2471_v16, %v2470_v63  ;;  %v2477_v19 = vadd.f32 %v2476_v17, %v2475_v15 }
0x11a6   :  { %v2473_v20 = vrot.slane %v2472_v18, 1  ;;  %v2478_v21 = vrot.slane %v2477_v19, 2 }
0x11a8   :  { %v2479_v22 = vadd.f32 %v2478_v21, %v2477_v19  ;;  %v2474_v23 = vadd.f32 %v2473_v20, %v2472_v18 }
0x11aa   :  { %v2480_v24 = vrot.slane %v2479_v22, 1  ;;  %v2483_v26 = vmul.f32 0.125, %v2474_v23 }
0x11ac   :  { %v2481_v25 = vadd.f32 %v2480_v24, %v2479_v22 }
0x11ae   :  { %v2484_v27 = vmul.f32 0.125, %v2481_v25 }
0x11b0   :  { %v2499_v28 = vsel %vm2498_vm5, %v2484_v27, %v2483_v26 }
0x11b1   :  { %3119 = vmatmul.mubr.msk.f32.vlgmr.msra.gmra.mxu1 %vm127_vm2, %v2499_v28 }
0x1271   :  { %v2568_v30 = vpop.f32.mrf.mxu1 }
0x1272   :  { %v2569_v31 = vadd.f32 %v2759_v29, %v2568_v30 }
0x1273   :  { %v3120_v32 = vpop.f32.mrf.mxu1 }
0x1274   :  { %2573 = vst.msk [vmem:[%s3752_s12] sm:$0x3] %vm2572_vm6, %v2569_v31 }

</bundles_post_ra>
